<compile_context>
chip_gen: v5e
topology: v5e:2x2
jax: 0.10.0
libtpu: 0.0.40
codegen_flags: <defaults>
</compile_context>

<pallas_src>
import functools

import numpy as np
import jax
import jax.numpy as jnp
from jax.experimental import pallas as pl
from jax.experimental.pallas import tpu as pltpu

D_ATTN = 8      # d_attention
D_EMB = 128     # d_embedding
D_FF = 512      # dim_feedforward
A_PAD = 128     # head dim zero-padded to one full lane width
LN_EPS = 1e-5   # nn.LayerNorm default eps
NEG_BIG = -1e30  # finite "-inf" so all-masked rows don't produce NaN


def _layer_norm(x, gamma, beta):
    mean = jnp.mean(x, axis=-1, keepdims=True)
    var = jnp.mean((x - mean) ** 2, axis=-1, keepdims=True)
    inv = jax.lax.rsqrt(var + LN_EPS)
    return (x - mean) * inv * gamma + beta


def encoder_classifier_kernel(
    x_ref, mask_ref,
    wqkv_ref, bqkv_ref, wo_ref, bo_ref,
    g1_ref, beta1_ref, w1_ref, b1_ref, w2_ref, b2_ref, g2_ref, beta2_ref,
    wc_ref, bc_ref,
    out_ref,
):
    x = x_ref[...]                       # (TB, S, D) float32
    mask = mask_ref[...]                 # (TB, S)    float32, 1.0 = valid token
    TB, S, D = x.shape
    M = TB * S

    x2d = x.reshape(M, D)                # merge (TB, S) -> M: full-sublane MXU calls
    x2d_bf = x2d.astype(jnp.bfloat16)

    # ---- fused q/k/v projection: one (M, D) @ (D, 3*A_PAD) MXU call, bf16 in / f32 acc.
    # Head dim is zero-padded 8 -> 128, so padded columns are exactly zero and all
    # downstream slices are lane-aligned.
    qkv = jnp.dot(x2d_bf, wqkv_ref[...],
                  preferred_element_type=jnp.float32) + bqkv_ref[...]        # (M, 3*A_PAD)
    q = qkv[:, 0:A_PAD].reshape(TB, S, A_PAD)
    k = qkv[:, A_PAD:2 * A_PAD].reshape(TB, S, A_PAD)
    v = qkv[:, 2 * A_PAD:3 * A_PAD].reshape(TB, S, A_PAD)

    # ---- SimpleAttention scores + softmax (f32; zero-padded head cols contribute 0).
    # These per-batch contractions are tiny; kept off the critical FFN MXU stream.
    scores = jnp.einsum('bqa,bka->bqk', q, k,
                        preferred_element_type=jnp.float32)
    scores = scores * (1.0 / np.sqrt(D_ATTN))
    scores = jnp.where(mask[:, None, :] > 0.0, scores, NEG_BIG)
    m = jnp.max(scores, axis=-1, keepdims=True)
    e = jnp.exp(scores - m)
    attn = e * (1.0 / jnp.sum(e, axis=-1, keepdims=True))    # reciprocal-multiply

    ctx = jnp.einsum('bqk,bka->bqa', attn, v,
                     preferred_element_type=jnp.float32)                      # (TB,S,A_PAD)
    attn_out = jnp.dot(ctx.reshape(M, A_PAD).astype(jnp.bfloat16), wo_ref[...],
                       preferred_element_type=jnp.float32) + bo_ref[...]      # (M, D)

    # ---- residual + norm1 (nn.Dropout is identity in eval/inference mode)
    x1 = _layer_norm(x2d + attn_out, g1_ref[...], beta1_ref[...])             # (M, D) f32

    # ---- feed-forward: Linear(D, FF) -> ReLU -> Linear(FF, D), bf16 MXU / f32 acc
    h = jnp.dot(x1.astype(jnp.bfloat16), w1_ref[...],
                preferred_element_type=jnp.float32) + b1_ref[...]             # (M, FF)
    h = jnp.maximum(h, 0.0)
    ff = jnp.dot(h.astype(jnp.bfloat16), w2_ref[...],
                 preferred_element_type=jnp.float32) + b2_ref[...]            # (M, D)

    x2 = _layer_norm(x1 + ff, g2_ref[...], beta2_ref[...])                    # (M, D)

    # ---- masked mean pooling + lane-padded classifier (output width 128, dense store)
    x2_3d = x2.reshape(TB, S, D)
    lengths = jnp.maximum(jnp.sum(mask, axis=1, keepdims=True), 1.0)          # (TB, 1)
    pooled = jnp.sum(x2_3d * mask[:, :, None], axis=1) * (1.0 / lengths)      # (TB, D)

    logits = jnp.dot(pooled.astype(jnp.bfloat16), wc_ref[...],
                     preferred_element_type=jnp.float32) + bc_ref[...]        # (TB, 128)
    out_ref[...] = logits


def init_params(key, vocab_size):
    """PyTorch-style uniform init; weights stored transposed (d_in, d_out), f32."""
    keys = jax.random.split(key, 9)

    def linear(k, fan_in, fan_out):
        bound = 1.0 / np.sqrt(fan_in)
        kw, kb = jax.random.split(k)
        w = jax.random.uniform(kw, (fan_in, fan_out), jnp.float32, -bound, bound)
        b = jax.random.uniform(kb, (1, fan_out), jnp.float32, -bound, bound)
        return w, b

    p = {}
    p['embed'] = jax.random.normal(keys[0], (vocab_size, D_EMB), jnp.float32)
    p['wq'], p['bq'] = linear(keys[1], D_EMB, D_ATTN)
    p['wk'], p['bk'] = linear(keys[2], D_EMB, D_ATTN)
    p['wv'], p['bv'] = linear(keys[3], D_EMB, D_ATTN)
    p['wo'], p['bo'] = linear(keys[4], D_ATTN, D_EMB)
    p['g1'] = jnp.ones((1, D_EMB), jnp.float32)
    p['beta1'] = jnp.zeros((1, D_EMB), jnp.float32)
    p['w1'], p['b1'] = linear(keys[5], D_EMB, D_FF)
    p['w2'], p['b2'] = linear(keys[6], D_FF, D_EMB)
    p['g2'] = jnp.ones((1, D_EMB), jnp.float32)
    p['beta2'] = jnp.zeros((1, D_EMB), jnp.float32)
    p['wc'], p['bc'] = linear(keys[7], D_EMB, 2)
    return p


def pack_params(p):
    """Fuse Wq/Wk/Wv, zero-pad the 8-wide head / 2-wide classifier dims to 128 lanes,
    and cast matmul weights to bf16 (biases / LN params stay f32)."""
    def pad_cols(w, width):
        return jnp.pad(w, ((0, 0), (0, width - w.shape[1])))

    wqkv = jnp.concatenate(
        [pad_cols(p['wq'], A_PAD), pad_cols(p['wk'], A_PAD), pad_cols(p['wv'], A_PAD)],
        axis=1)                                                    # (128, 384)
    bqkv = jnp.concatenate(
        [pad_cols(p['bq'], A_PAD), pad_cols(p['bk'], A_PAD), pad_cols(p['bv'], A_PAD)],
        axis=1)                                                    # (1, 384)
    wo = jnp.pad(p['wo'], ((0, A_PAD - D_ATTN), (0, 0)))           # (128, 128), rows>=8 zero
    wc = pad_cols(p['wc'], 128)                                    # (128, 128), cols>=2 zero
    bc = pad_cols(p['bc'], 128)                                    # (1, 128)

    return {
        'embed': p['embed'],
        'wqkv': wqkv.astype(jnp.bfloat16), 'bqkv': bqkv,
        'wo': wo.astype(jnp.bfloat16), 'bo': p['bo'],
        'g1': p['g1'], 'beta1': p['beta1'],
        'w1': p['w1'].astype(jnp.bfloat16), 'b1': p['b1'],
        'w2': p['w2'].astype(jnp.bfloat16), 'b2': p['b2'],
        'g2': p['g2'], 'beta2': p['beta2'],
        'wc': wc.astype(jnp.bfloat16), 'bc': bc,
    }


@functools.partial(jax.jit, static_argnames=("batch_tile",))
def request_classifier_forward(src, pad_mask, kparams, *, batch_tile=8):
    """src: (B, S) int32 token ids; pad_mask: (B, S) bool, True = padding."""
    x = kparams['embed'][src]                       # (B, S, D) f32 embedding gather (glue)
    valid = 1.0 - pad_mask.astype(jnp.float32)      # (B, S) 1.0 where valid
    B, S = src.shape

    TB = batch_tile
    nb = (B + TB - 1) // TB
    B_pad = nb * TB
    if B_pad != B:  # pad batch to a multiple of the tile; padded rows are fully masked
        x = jnp.pad(x, ((0, B_pad - B), (0, 0), (0, 0)))
        valid = jnp.pad(valid, ((0, B_pad - B), (0, 0)))

    weights = [
        kparams['wqkv'], kparams['bqkv'], kparams['wo'], kparams['bo'],
        kparams['g1'], kparams['beta1'], kparams['w1'], kparams['b1'],
        kparams['w2'], kparams['b2'], kparams['g2'], kparams['beta2'],
        kparams['wc'], kparams['bc'],
    ]
    operands = [x, valid] + weights

    # Weights: index_map always returns block 0 -> stays VMEM-resident across grid steps.
    w_specs = [pl.BlockSpec(w.shape, lambda i: (0, 0)) for w in weights]
    in_specs = [
        pl.BlockSpec((TB, S, D_EMB), lambda i: (i, 0, 0)),   # x tile (double-buffered)
        pl.BlockSpec((TB, S), lambda i: (i, 0)),             # mask tile
    ] + w_specs
    out_spec = pl.BlockSpec((TB, 128), lambda i: (i, 0))     # lane-dense logits

    out = pl.pallas_call(
        encoder_classifier_kernel,
        out_shape=jax.ShapeDtypeStruct((B_pad, 128), jnp.float32),
        grid=(nb,),
        in_specs=in_specs,
        out_specs=out_spec,
        compiler_params=pltpu.CompilerParams(
            dimension_semantics=("parallel",),        # v7x: shard batch axis across 2 TCs
            vmem_limit_bytes=32 * 1024 * 1024,        # safe on v5e/v6e/v7x for these tiles
        ),
    )(*operands)
    return out[:B, :2]


def reference_forward(src, pad_mask, params):
    """Pure-JAX f32 reference implementing the PyTorch eval-mode semantics."""
    x = params['embed'][src]
    mask = 1.0 - pad_mask.astype(jnp.float32)
    q = jnp.einsum('bsd,da->bsa', x, params['wq']) + params['bq']
    k = jnp.einsum('bsd,da->bsa', x, params['wk']) + params['bk']
    v = jnp.einsum('bsd,da->bsa', x, params['wv']) + params['bv']
    scores = jnp.einsum('bqa,bka->bqk', q, k) / np.sqrt(D_ATTN)
    scores = jnp.where(mask[:, None, :] > 0.0, scores, -jnp.inf)
    attn = jax.nn.softmax(scores, axis=-1)
    ctx = jnp.einsum('bqk,bka->bqa', attn, v)
    attn_out = jnp.einsum('bqa,ad->bqd', ctx, params['wo']) + params['bo']
    x1 = _layer_norm(x + attn_out, params['g1'], params['beta1'])
    h = jnp.maximum(jnp.einsum('bsd,df->bsf', x1, params['w1']) + params['b1'], 0.0)
    ff = jnp.einsum('bsf,fd->bsd', h, params['w2']) + params['b2']
    x2 = _layer_norm(x1 + ff, params['g2'], params['beta2'])
    lengths = jnp.maximum(jnp.sum(mask, axis=1, keepdims=True), 1.0)
    pooled = jnp.sum(x2 * mask[:, :, None], axis=1) / lengths
    return pooled @ params['wc'] + params['bc']


if __name__ == "__main__":
    # TODO(synk): nn.Dropout(p=0.1) is implemented as identity (eval/inference mode);
    # training-mode stochastic dropout is not reproduced.
    key = jax.random.PRNGKey(0)
    kp, ks, kl = jax.random.split(key, 3)

    vocab_size = 32
    B, S = 16, 8   # B=16 with batch_tile=8 -> grid of 2 (exercises pipelining / megacore)

    params = init_params(kp, vocab_size)
    kparams = pack_params(params)

    src = jax.random.randint(ks, (B, S), 0, vocab_size, dtype=jnp.int32)
    lengths = jax.random.randint(kl, (B,), 1, S + 1)            # >=1 valid token per row
    pad_mask = jnp.arange(S)[None, :] >= lengths[:, None]       # True = padding

    logits = request_classifier_forward(src, pad_mask, kparams, batch_tile=8)
    jax.block_until_ready(logits)

    ref = reference_forward(src, pad_mask, params)
    assert logits.shape == (B, 2)
    # bf16 MXU inputs with f32 accumulation -> loosened tolerance vs the pure-f32 reference.
    np.testing.assert_allclose(np.asarray(logits), np.asarray(ref),
                               rtol=5e-2, atol=5e-2)
    print("KERNEL_OK")
</pallas_src>

<mosaic_0001>
module attributes {stable_mosaic.version = 11 : i64} {
  func.func @encoder_classifier_kernel(%arg0: i32, %arg1: memref<8x8x128xf32, #tpu.memory_space<vmem>>, %arg2: memref<8x8xf32, #tpu.memory_space<vmem>>, %arg3: memref<128x384xbf16, #tpu.memory_space<vmem>>, %arg4: memref<1x384xf32, #tpu.memory_space<vmem>>, %arg5: memref<128x128xbf16, #tpu.memory_space<vmem>>, %arg6: memref<1x128xf32, #tpu.memory_space<vmem>>, %arg7: memref<1x128xf32, #tpu.memory_space<vmem>>, %arg8: memref<1x128xf32, #tpu.memory_space<vmem>>, %arg9: memref<128x512xbf16, #tpu.memory_space<vmem>>, %arg10: memref<1x512xf32, #tpu.memory_space<vmem>>, %arg11: memref<512x128xbf16, #tpu.memory_space<vmem>>, %arg12: memref<1x128xf32, #tpu.memory_space<vmem>>, %arg13: memref<1x128xf32, #tpu.memory_space<vmem>>, %arg14: memref<1x128xf32, #tpu.memory_space<vmem>>, %arg15: memref<128x128xbf16, #tpu.memory_space<vmem>>, %arg16: memref<1x128xf32, #tpu.memory_space<vmem>>, %arg17: memref<8x128xf32, #tpu.memory_space<vmem>>) attributes {dimension_semantics = [#tpu.dimension_semantics<parallel>], iteration_bounds = array<i64: 2>, scalar_prefetch = 0 : i64, scratch_operands = 0 : i64, tpu.core_type = #tpu.core_type<tc>, window_params = [{transform_indices = @transform_0, window_bounds = array<i64: 8, 8, 128>}, {transform_indices = @transform_1, window_bounds = array<i64: 8, 8>}, {pipeline_mode = #tpu.pipeline_mode<synchronous>, transform_indices = @transform_2, window_bounds = array<i64: 128, 384>}, {pipeline_mode = #tpu.pipeline_mode<synchronous>, transform_indices = @transform_3, window_bounds = array<i64: 1, 384>}, {pipeline_mode = #tpu.pipeline_mode<synchronous>, transform_indices = @transform_4, window_bounds = array<i64: 128, 128>}, {pipeline_mode = #tpu.pipeline_mode<synchronous>, transform_indices = @transform_5, window_bounds = array<i64: 1, 128>}, {pipeline_mode = #tpu.pipeline_mode<synchronous>, transform_indices = @transform_6, window_bounds = array<i64: 1, 128>}, {pipeline_mode = #tpu.pipeline_mode<synchronous>, transform_indices = @transform_7, window_bounds = array<i64: 1, 128>}, {pipeline_mode = #tpu.pipeline_mode<synchronous>, transform_indices = @transform_8, window_bounds = array<i64: 128, 512>}, {pipeline_mode = #tpu.pipeline_mode<synchronous>, transform_indices = @transform_9, window_bounds = array<i64: 1, 512>}, {pipeline_mode = #tpu.pipeline_mode<synchronous>, transform_indices = @transform_10, window_bounds = array<i64: 512, 128>}, {pipeline_mode = #tpu.pipeline_mode<synchronous>, transform_indices = @transform_11, window_bounds = array<i64: 1, 128>}, {pipeline_mode = #tpu.pipeline_mode<synchronous>, transform_indices = @transform_12, window_bounds = array<i64: 1, 128>}, {pipeline_mode = #tpu.pipeline_mode<synchronous>, transform_indices = @transform_13, window_bounds = array<i64: 1, 128>}, {pipeline_mode = #tpu.pipeline_mode<synchronous>, transform_indices = @transform_14, window_bounds = array<i64: 128, 128>}, {pipeline_mode = #tpu.pipeline_mode<synchronous>, transform_indices = @transform_15, window_bounds = array<i64: 1, 128>}, {transform_indices = @transform_16, window_bounds = array<i64: 8, 128>}]} {
    %c0 = arith.constant 0 : index
    %c0_0 = arith.constant 0 : index
    %c0_1 = arith.constant 0 : index
    %0 = vector.load %arg1[%c0, %c0_0, %c0_1] : memref<8x8x128xf32, #tpu.memory_space<vmem>>, vector<8x8x128xf32>
    %c0_2 = arith.constant 0 : index
    %c0_3 = arith.constant 0 : index
    %1 = vector.load %arg2[%c0_2, %c0_3] : memref<8x8xf32, #tpu.memory_space<vmem>>, vector<8x8xf32>
    %2 = vector.shape_cast %0 : vector<8x8x128xf32> to vector<64x128xf32>
    %3 = arith.truncf %2 : vector<64x128xf32> to vector<64x128xbf16>
    %c0_4 = arith.constant 0 : index
    %c0_5 = arith.constant 0 : index
    %4 = vector.load %arg3[%c0_4, %c0_5] : memref<128x384xbf16, #tpu.memory_space<vmem>>, vector<128x384xbf16>
    %cst = arith.constant dense<0.000000e+00> : vector<64x384xf32>
    %5 = tpu.matmul %3, %4, %cst {dimension_numbers = #tpu.dot_dimension_numbers<[1], [0], [0], [1], [0, 0, 1, 1], [], []>} : vector<64x128xbf16>, vector<128x384xbf16>, vector<64x384xf32> -> vector<64x384xf32>
    %c0_6 = arith.constant 0 : index
    %c0_7 = arith.constant 0 : index
    %6 = vector.load %arg4[%c0_6, %c0_7] : memref<1x384xf32, #tpu.memory_space<vmem>>, vector<1x384xf32>
    %7 = vector.broadcast %6 : vector<1x384xf32> to vector<64x384xf32>
    %8 = arith.addf %5, %7 : vector<64x384xf32>
    %9 = vector.extract_strided_slice %8 {offsets = [0, 0], sizes = [64, 128], strides = [1, 1]} : vector<64x384xf32> to vector<64x128xf32>
    %10 = vector.shape_cast %9 : vector<64x128xf32> to vector<8x8x128xf32>
    %11 = vector.extract_strided_slice %8 {offsets = [0, 128], sizes = [64, 128], strides = [1, 1]} : vector<64x384xf32> to vector<64x128xf32>
    %12 = vector.shape_cast %11 : vector<64x128xf32> to vector<8x8x128xf32>
    %13 = vector.extract_strided_slice %8 {offsets = [0, 256], sizes = [64, 128], strides = [1, 1]} : vector<64x384xf32> to vector<64x128xf32>
    %14 = vector.shape_cast %13 : vector<64x128xf32> to vector<8x8x128xf32>
    "tpu.trace_start"() <{level = 10 : i32, message = "bqa,bka->bqk"}> : () -> ()
    %cst_8 = arith.constant dense<0.000000e+00> : vector<8x8x8xf32>
    %15 = tpu.matmul %10, %12, %cst_8 {dimension_numbers = #tpu.dot_dimension_numbers<[2], [2], [1], [1], [0, 0, 0, 1, 1, 1], [0], [0]>} : vector<8x8x128xf32>, vector<8x8x128xf32>, vector<8x8x8xf32> -> vector<8x8x8xf32>
    "tpu.trace_stop"() : () -> ()
    %cst_9 = arith.constant 0.353553385 : f32
    %16 = vector.broadcast %cst_9 : f32 to vector<8x8x8xf32>
    %17 = arith.mulf %15, %16 : vector<8x8x8xf32>
    %18 = vector.shape_cast %1 : vector<8x8xf32> to vector<8x1x8xf32>
    %cst_10 = arith.constant 0.000000e+00 : f32
    %19 = vector.broadcast %cst_10 : f32 to vector<8x1x8xf32>
    %20 = arith.cmpf ogt, %18, %19 : vector<8x1x8xf32>
    %cst_11 = arith.constant -1.000000e+30 : f32
    %21 = vector.shape_cast %20 : vector<8x1x8xi1> to vector<8x1x8xi1>
    %22 = vector.broadcast %21 : vector<8x1x8xi1> to vector<8x8x8xi1>
    %23 = vector.broadcast %cst_11 : f32 to vector<8x8x8xf32>
    %24 = arith.select %22, %17, %23 : vector<8x8x8xi1>, vector<8x8x8xf32>
    %cst_12 = arith.constant dense<0xFF800000> : vector<8x8xf32>
    %25 = vector.multi_reduction <maximumf>, %24, %cst_12 [2] : vector<8x8x8xf32> to vector<8x8xf32>
    %26 = vector.shape_cast %25 : vector<8x8xf32> to vector<8x8x1xf32>
    %27 = vector.broadcast %26 : vector<8x8x1xf32> to vector<8x8x8xf32>
    %28 = arith.subf %24, %27 : vector<8x8x8xf32>
    %29 = math.exp %28 : vector<8x8x8xf32>
    %cst_13 = arith.constant dense<0.000000e+00> : vector<8x8xf32>
    %30 = vector.multi_reduction <add>, %29, %cst_13 [2] : vector<8x8x8xf32> to vector<8x8xf32>
    %31 = vector.shape_cast %30 : vector<8x8xf32> to vector<8x8x1xf32>
    %cst_14 = arith.constant 1.000000e+00 : f32
    %32 = vector.broadcast %cst_14 : f32 to vector<8x8x1xf32>
    %33 = arith.divf %32, %31 : vector<8x8x1xf32>
    %34 = vector.broadcast %33 : vector<8x8x1xf32> to vector<8x8x8xf32>
    %35 = arith.mulf %29, %34 : vector<8x8x8xf32>
    "tpu.trace_start"() <{level = 10 : i32, message = "bqk,bka->bqa"}> : () -> ()
    %cst_15 = arith.constant dense<0.000000e+00> : vector<8x8x128xf32>
    %36 = tpu.matmul %35, %14, %cst_15 {dimension_numbers = #tpu.dot_dimension_numbers<[2], [1], [1], [2], [0, 0, 0, 1, 1, 2], [0], [0]>} : vector<8x8x8xf32>, vector<8x8x128xf32>, vector<8x8x128xf32> -> vector<8x8x128xf32>
    "tpu.trace_stop"() : () -> ()
    %37 = vector.shape_cast %36 : vector<8x8x128xf32> to vector<64x128xf32>
    %38 = arith.truncf %37 : vector<64x128xf32> to vector<64x128xbf16>
    %c0_16 = arith.constant 0 : index
    %c0_17 = arith.constant 0 : index
    %39 = vector.load %arg5[%c0_16, %c0_17] : memref<128x128xbf16, #tpu.memory_space<vmem>>, vector<128x128xbf16>
    %cst_18 = arith.constant dense<0.000000e+00> : vector<64x128xf32>
    %40 = tpu.matmul %38, %39, %cst_18 {dimension_numbers = #tpu.dot_dimension_numbers<[1], [0], [0], [1], [0, 0, 1, 1], [], []>} : vector<64x128xbf16>, vector<128x128xbf16>, vector<64x128xf32> -> vector<64x128xf32>
    %c0_19 = arith.constant 0 : index
    %c0_20 = arith.constant 0 : index
    %41 = vector.load %arg6[%c0_19, %c0_20] : memref<1x128xf32, #tpu.memory_space<vmem>>, vector<1x128xf32>
    %42 = vector.broadcast %41 : vector<1x128xf32> to vector<64x128xf32>
    %43 = arith.addf %40, %42 : vector<64x128xf32>
    %44 = arith.addf %2, %43 : vector<64x128xf32>
    %c0_21 = arith.constant 0 : index
    %c0_22 = arith.constant 0 : index
    %45 = vector.load %arg7[%c0_21, %c0_22] : memref<1x128xf32, #tpu.memory_space<vmem>>, vector<1x128xf32>
    %c0_23 = arith.constant 0 : index
    %c0_24 = arith.constant 0 : index
    %46 = vector.load %arg8[%c0_23, %c0_24] : memref<1x128xf32, #tpu.memory_space<vmem>>, vector<1x128xf32>
    %cst_25 = arith.constant dense<0.000000e+00> : vector<64xf32>
    %47 = vector.multi_reduction <add>, %44, %cst_25 [1] : vector<64x128xf32> to vector<64xf32>
    %48 = vector.shape_cast %47 : vector<64xf32> to vector<64x1xf32>
    %cst_26 = arith.constant 1.280000e+02 : f32
    %49 = vector.broadcast %cst_26 : f32 to vector<64x1xf32>
    %50 = arith.divf %48, %49 : vector<64x1xf32>
    %51 = vector.broadcast %50 : vector<64x1xf32> to vector<64x128xf32>
    %52 = arith.subf %44, %51 : vector<64x128xf32>
    %53 = arith.mulf %52, %52 : vector<64x128xf32>
    %cst_27 = arith.constant dense<0.000000e+00> : vector<64xf32>
    %54 = vector.multi_reduction <add>, %53, %cst_27 [1] : vector<64x128xf32> to vector<64xf32>
    %55 = vector.shape_cast %54 : vector<64xf32> to vector<64x1xf32>
    %cst_28 = arith.constant 1.280000e+02 : f32
    %56 = vector.broadcast %cst_28 : f32 to vector<64x1xf32>
    %57 = arith.divf %55, %56 : vector<64x1xf32>
    %cst_29 = arith.constant 9.99999974E-6 : f32
    %58 = vector.broadcast %cst_29 : f32 to vector<64x1xf32>
    %59 = arith.addf %57, %58 : vector<64x1xf32>
    %60 = math.rsqrt %59 : vector<64x1xf32>
    %61 = vector.broadcast %50 : vector<64x1xf32> to vector<64x128xf32>
    %62 = arith.subf %44, %61 : vector<64x128xf32>
    %63 = vector.broadcast %60 : vector<64x1xf32> to vector<64x128xf32>
    %64 = arith.mulf %62, %63 : vector<64x128xf32>
    %65 = vector.broadcast %45 : vector<1x128xf32> to vector<64x128xf32>
    %66 = arith.mulf %64, %65 : vector<64x128xf32>
    %67 = vector.broadcast %46 : vector<1x128xf32> to vector<64x128xf32>
    %68 = arith.addf %66, %67 : vector<64x128xf32>
    %69 = arith.truncf %68 : vector<64x128xf32> to vector<64x128xbf16>
    %c0_30 = arith.constant 0 : index
    %c0_31 = arith.constant 0 : index
    %70 = vector.load %arg9[%c0_30, %c0_31] : memref<128x512xbf16, #tpu.memory_space<vmem>>, vector<128x512xbf16>
    %cst_32 = arith.constant dense<0.000000e+00> : vector<64x512xf32>
    %71 = tpu.matmul %69, %70, %cst_32 {dimension_numbers = #tpu.dot_dimension_numbers<[1], [0], [0], [1], [0, 0, 1, 1], [], []>} : vector<64x128xbf16>, vector<128x512xbf16>, vector<64x512xf32> -> vector<64x512xf32>
    %c0_33 = arith.constant 0 : index
    %c0_34 = arith.constant 0 : index
    %72 = vector.load %arg10[%c0_33, %c0_34] : memref<1x512xf32, #tpu.memory_space<vmem>>, vector<1x512xf32>
    %73 = vector.broadcast %72 : vector<1x512xf32> to vector<64x512xf32>
    %74 = arith.addf %71, %73 : vector<64x512xf32>
    %cst_35 = arith.constant 0.000000e+00 : f32
    %75 = vector.broadcast %cst_35 : f32 to vector<64x512xf32>
    %76 = arith.maximumf %74, %75 : vector<64x512xf32>
    %77 = arith.truncf %76 : vector<64x512xf32> to vector<64x512xbf16>
    %c0_36 = arith.constant 0 : index
    %c0_37 = arith.constant 0 : index
    %78 = vector.load %arg11[%c0_36, %c0_37] : memref<512x128xbf16, #tpu.memory_space<vmem>>, vector<512x128xbf16>
    %cst_38 = arith.constant dense<0.000000e+00> : vector<64x128xf32>
    %79 = tpu.matmul %77, %78, %cst_38 {dimension_numbers = #tpu.dot_dimension_numbers<[1], [0], [0], [1], [0, 0, 1, 1], [], []>} : vector<64x512xbf16>, vector<512x128xbf16>, vector<64x128xf32> -> vector<64x128xf32>
    %c0_39 = arith.constant 0 : index
    %c0_40 = arith.constant 0 : index
    %80 = vector.load %arg12[%c0_39, %c0_40] : memref<1x128xf32, #tpu.memory_space<vmem>>, vector<1x128xf32>
    %81 = vector.broadcast %80 : vector<1x128xf32> to vector<64x128xf32>
    %82 = arith.addf %79, %81 : vector<64x128xf32>
    %83 = arith.addf %68, %82 : vector<64x128xf32>
    %c0_41 = arith.constant 0 : index
    %c0_42 = arith.constant 0 : index
    %84 = vector.load %arg13[%c0_41, %c0_42] : memref<1x128xf32, #tpu.memory_space<vmem>>, vector<1x128xf32>
    %c0_43 = arith.constant 0 : index
    %c0_44 = arith.constant 0 : index
    %85 = vector.load %arg14[%c0_43, %c0_44] : memref<1x128xf32, #tpu.memory_space<vmem>>, vector<1x128xf32>
    %cst_45 = arith.constant dense<0.000000e+00> : vector<64xf32>
    %86 = vector.multi_reduction <add>, %83, %cst_45 [1] : vector<64x128xf32> to vector<64xf32>
    %87 = vector.shape_cast %86 : vector<64xf32> to vector<64x1xf32>
    %cst_46 = arith.constant 1.280000e+02 : f32
    %88 = vector.broadcast %cst_46 : f32 to vector<64x1xf32>
    %89 = arith.divf %87, %88 : vector<64x1xf32>
    %90 = vector.broadcast %89 : vector<64x1xf32> to vector<64x128xf32>
    %91 = arith.subf %83, %90 : vector<64x128xf32>
    %92 = arith.mulf %91, %91 : vector<64x128xf32>
    %cst_47 = arith.constant dense<0.000000e+00> : vector<64xf32>
    %93 = vector.multi_reduction <add>, %92, %cst_47 [1] : vector<64x128xf32> to vector<64xf32>
    %94 = vector.shape_cast %93 : vector<64xf32> to vector<64x1xf32>
    %cst_48 = arith.constant 1.280000e+02 : f32
    %95 = vector.broadcast %cst_48 : f32 to vector<64x1xf32>
    %96 = arith.divf %94, %95 : vector<64x1xf32>
    %cst_49 = arith.constant 9.99999974E-6 : f32
    %97 = vector.broadcast %cst_49 : f32 to vector<64x1xf32>
    %98 = arith.addf %96, %97 : vector<64x1xf32>
    %99 = math.rsqrt %98 : vector<64x1xf32>
    %100 = vector.broadcast %89 : vector<64x1xf32> to vector<64x128xf32>
    %101 = arith.subf %83, %100 : vector<64x128xf32>
    %102 = vector.broadcast %99 : vector<64x1xf32> to vector<64x128xf32>
    %103 = arith.mulf %101, %102 : vector<64x128xf32>
    %104 = vector.broadcast %84 : vector<1x128xf32> to vector<64x128xf32>
    %105 = arith.mulf %103, %104 : vector<64x128xf32>
    %106 = vector.broadcast %85 : vector<1x128xf32> to vector<64x128xf32>
    %107 = arith.addf %105, %106 : vector<64x128xf32>
    %108 = vector.shape_cast %107 : vector<64x128xf32> to vector<8x8x128xf32>
    %cst_50 = arith.constant dense<0.000000e+00> : vector<8xf32>
    %109 = vector.multi_reduction <add>, %1, %cst_50 [1] : vector<8x8xf32> to vector<8xf32>
    %110 = vector.shape_cast %109 : vector<8xf32> to vector<8x1xf32>
    %cst_51 = arith.constant 1.000000e+00 : f32
    %111 = vector.broadcast %cst_51 : f32 to vector<8x1xf32>
    %112 = arith.maximumf %110, %111 : vector<8x1xf32>
    %113 = vector.shape_cast %1 : vector<8x8xf32> to vector<8x8x1xf32>
    %114 = vector.broadcast %113 : vector<8x8x1xf32> to vector<8x8x128xf32>
    %115 = arith.mulf %108, %114 : vector<8x8x128xf32>
    %cst_52 = arith.constant dense<0.000000e+00> : vector<8x128xf32>
    %116 = vector.multi_reduction <add>, %115, %cst_52 [1] : vector<8x8x128xf32> to vector<8x128xf32>
    %cst_53 = arith.constant 1.000000e+00 : f32
    %117 = vector.broadcast %cst_53 : f32 to vector<8x1xf32>
    %118 = arith.divf %117, %112 : vector<8x1xf32>
    %119 = vector.broadcast %118 : vector<8x1xf32> to vector<8x128xf32>
    %120 = arith.mulf %116, %119 : vector<8x128xf32>
    %121 = arith.truncf %120 : vector<8x128xf32> to vector<8x128xbf16>
    %c0_54 = arith.constant 0 : index
    %c0_55 = arith.constant 0 : index
    %122 = vector.load %arg15[%c0_54, %c0_55] : memref<128x128xbf16, #tpu.memory_space<vmem>>, vector<128x128xbf16>
    %cst_56 = arith.constant dense<0.000000e+00> : vector<8x128xf32>
    %123 = tpu.matmul %121, %122, %cst_56 {dimension_numbers = #tpu.dot_dimension_numbers<[1], [0], [0], [1], [0, 0, 1, 1], [], []>} : vector<8x128xbf16>, vector<128x128xbf16>, vector<8x128xf32> -> vector<8x128xf32>
    %c0_57 = arith.constant 0 : index
    %c0_58 = arith.constant 0 : index
    %124 = vector.load %arg16[%c0_57, %c0_58] : memref<1x128xf32, #tpu.memory_space<vmem>>, vector<1x128xf32>
    %125 = vector.broadcast %124 : vector<1x128xf32> to vector<8x128xf32>
    %126 = arith.addf %123, %125 : vector<8x128xf32>
    %c0_59 = arith.constant 0 : index
    %c0_60 = arith.constant 0 : index
    %127 = vector.load %arg17[%c0_59, %c0_60] : memref<8x128xf32, #tpu.memory_space<vmem>>, vector<8x128xf32>
    tpu.vector_store %arg17[%c0_59, %c0_60], %126 {strides = array<i32>} : memref<8x128xf32, #tpu.memory_space<vmem>>, vector<8x128xf32>,
    return
  }
  func.func @transform_0(%arg0: i32) -> (i32, i32, i32) {
    %c0_i32 = arith.constant 0 : i32
    %c0_i32_0 = arith.constant 0 : i32
    %c0_i32_1 = arith.constant 0 : i32
    return %arg0, %c0_i32, %c0_i32_0 : i32, i32, i32
  }
  func.func @transform_1(%arg0: i32) -> (i32, i32) {
    %c0_i32 = arith.constant 0 : i32
    %c0_i32_0 = arith.constant 0 : i32
    return %arg0, %c0_i32 : i32, i32
  }
  func.func @transform_2(%arg0: i32) -> (i32, i32) {
    %c0_i32 = arith.constant 0 : i32
    %c0_i32_0 = arith.constant 0 : i32
    %c0_i32_1 = arith.constant 0 : i32
    return %c0_i32, %c0_i32_0 : i32, i32
  }
  func.func @transform_3(%arg0: i32) -> (i32, i32) {
    %c0_i32 = arith.constant 0 : i32
    %c0_i32_0 = arith.constant 0 : i32
    %c0_i32_1 = arith.constant 0 : i32
    return %c0_i32, %c0_i32_0 : i32, i32
  }
  func.func @transform_4(%arg0: i32) -> (i32, i32) {
    %c0_i32 = arith.constant 0 : i32
    %c0_i32_0 = arith.constant 0 : i32
    %c0_i32_1 = arith.constant 0 : i32
    return %c0_i32, %c0_i32_0 : i32, i32
  }
  func.func @transform_5(%arg0: i32) -> (i32, i32) {
    %c0_i32 = arith.constant 0 : i32
    %c0_i32_0 = arith.constant 0 : i32
    %c0_i32_1 = arith.constant 0 : i32
    return %c0_i32, %c0_i32_0 : i32, i32
  }
  func.func @transform_6(%arg0: i32) -> (i32, i32) {
    %c0_i32 = arith.constant 0 : i32
    %c0_i32_0 = arith.constant 0 : i32
    %c0_i32_1 = arith.constant 0 : i32
    return %c0_i32, %c0_i32_0 : i32, i32
  }
  func.func @transform_7(%arg0: i32) -> (i32, i32) {
    %c0_i32 = arith.constant 0 : i32
    %c0_i32_0 = arith.constant 0 : i32
    %c0_i32_1 = arith.constant 0 : i32
    return %c0_i32, %c0_i32_0 : i32, i32
  }
  func.func @transform_8(%arg0: i32) -> (i32, i32) {
    %c0_i32 = arith.constant 0 : i32
    %c0_i32_0 = arith.constant 0 : i32
    %c0_i32_1 = arith.constant 0 : i32
    return %c0_i32, %c0_i32_0 : i32, i32
  }
  func.func @transform_9(%arg0: i32) -> (i32, i32) {
    %c0_i32 = arith.constant 0 : i32
    %c0_i32_0 = arith.constant 0 : i32
    %c0_i32_1 = arith.constant 0 : i32
    return %c0_i32, %c0_i32_0 : i32, i32
  }
  func.func @transform_10(%arg0: i32) -> (i32, i32) {
    %c0_i32 = arith.constant 0 : i32
    %c0_i32_0 = arith.constant 0 : i32
    %c0_i32_1 = arith.constant 0 : i32
    return %c0_i32, %c0_i32_0 : i32, i32
  }
  func.func @transform_11(%arg0: i32) -> (i32, i32) {
    %c0_i32 = arith.constant 0 : i32
    %c0_i32_0 = arith.constant 0 : i32
    %c0_i32_1 = arith.constant 0 : i32
    return %c0_i32, %c0_i32_0 : i32, i32
  }
  func.func @transform_12(%arg0: i32) -> (i32, i32) {
    %c0_i32 = arith.constant 0 : i32
    %c0_i32_0 = arith.constant 0 : i32
    %c0_i32_1 = arith.constant 0 : i32
    return %c0_i32, %c0_i32_0 : i32, i32
  }
  func.func @transform_13(%arg0: i32) -> (i32, i32) {
    %c0_i32 = arith.constant 0 : i32
    %c0_i32_0 = arith.constant 0 : i32
    %c0_i32_1 = arith.constant 0 : i32
    return %c0_i32, %c0_i32_0 : i32, i32
  }
  func.func @transform_14(%arg0: i32) -> (i32, i32) {
    %c0_i32 = arith.constant 0 : i32
    %c0_i32_0 = arith.constant 0 : i32
    %c0_i32_1 = arith.constant 0 : i32
    return %c0_i32, %c0_i32_0 : i32, i32
  }
  func.func @transform_15(%arg0: i32) -> (i32, i32) {
    %c0_i32 = arith.constant 0 : i32
    %c0_i32_0 = arith.constant 0 : i32
    %c0_i32_1 = arith.constant 0 : i32
    return %c0_i32, %c0_i32_0 : i32, i32
  }
  func.func @transform_16(%arg0: i32) -> (i32, i32) {
    %c0_i32 = arith.constant 0 : i32
    %c0_i32_0 = arith.constant 0 : i32
    return %arg0, %c0_i32 : i32, i32
  }
}

</mosaic_0001>

<bundles_post_ra>
// kernel: request_classifier_forward.1
= control target key start
LH: loop header
LB: loop body
LE: loop exit
PB: predicated region body
PF: predicated region fallthrough
CT: control target
= control target key end

     0   :  { %s3733_s21 = smov 0   ;;  %s4846_s0 = inlined_call_operand.vmem [shape: f32[16,8,128], index: 0, kind: input, shape index: {}]   ;;  %s4847_s1 = inlined_call_operand.vmem [shape: f32[16,8], index: 1, kind: input, shape index: {}]   ;;  %s4848_s2 = inlined_call_operand.vmem [shape: bf16[128,384], index: 2, kind: input, shape index: {}]   ;;  %s4849_s3 = inlined_call_operand.vmem [shape: f32[1,384], index: 3, kind: input, shape index: {}]   ;;  %s4850_s4 = inlined_call_operand.vmem [shape: bf16[128,128], index: 4, kind: input, shape index: {}]   ;;  %s4851_s5 = inlined_call_operand.vmem [shape: f32[1,128], index: 5, kind: input, shape index: {}]   ;;  %s4852_s6 = inlined_call_operand.vmem [shape: f32[1,128], index: 6, kind: input, shape index: {}]   ;;  %s4853_s7 = inlined_call_operand.vmem [shape: f32[1,128], index: 7, kind: input, shape index: {}]   ;;  %s4854_s8 = inlined_call_operand.vmem [shape: bf16[128,512], index: 8, kind: input, shape index: {}]   ;;  %s4855_s9 = inlined_call_operand.vmem [shape: f32[1,512], index: 9, kind: input, shape index: {}]   ;;  %s4856_s10 = inlined_call_operand.vmem [shape: bf16[512,128], index: 10, kind: input, shape index: {}]   ;;  %s4857_s11 = inlined_call_operand.vmem [shape: f32[1,128], index: 11, kind: input, shape index: {}]   ;;  %s4858_s12 = inlined_call_operand.vmem [shape: f32[1,128], index: 12, kind: input, shape index: {}]   ;;  %s4859_s13 = inlined_call_operand.vmem [shape: f32[1,128], index: 13, kind: input, shape index: {}]   ;;  %s4860_s14 = inlined_call_operand.vmem [shape: bf16[128,128], index: 14, kind: input, shape index: {}]   ;;  %s4861_s15 = inlined_call_operand.vmem [shape: f32[1,128], index: 15, kind: input, shape index: {}]   ;;  %s4862_s16 = inlined_call_operand.vmem [shape: f32[16,128], index: 16, kind: output, shape index: {}]  }
   0x1   :  { %4863 = sst [smem:[#allocation2_spill]] %s4846_s0 }
   0x2 LB: > { %s3739_s22 = sadd.s32 4294967295, %s3644_s21   ;;  %p3006_p0 = scmp.ge.s32.totalorder %s3644_s21, 1  ;;  %s3644_s21 = sphi %s3733_s21, %s26_s21  }
   0x3   : > { %p472_p1 = scmp.lt.s32.totalorder %s3644_s21, 3 }
   0x5   : > { %p473_p2 = pnand %p3006_p0, %p472_p1 }
   0x6   : > { %s3007_s18 = sshll.u32 (!%p473_p2), %s3739_s22, 3  ;;  %s4864_s17 = sld [smem:[#allocation2_spill]] (!%p473_p2) }
   0x7   : > { %476 = sbr.rel (%p473_p2) target bundleno = 1982 (0x7be), region = 84  ;;  %p526_p3 = scmp.lt.s32.totalorder (!%p473_p2), %s3007_s18, 15 }
   0x8   : > { %p531_p4 = scmp.lt.s32.totalorder (!%p473_p2), %s3739_s22, 1 }
   0xc   : > { %v3097_v0 = vld [vmem:[%s4848_s2 + $0xa8] sm:$0xf]  ;;  %v3459_v1 = vld [vmem:[%s4848_s2 + $0xb0] sm:$0xf0]  ;;  %v3458_v2 = vld [vmem:[%s4848_s2 + $0xac] sm:$0xf] }
   0xd   : > { %v3098_v3 = vor.u32 %v3459_v1, %v3097_v0  ;;  %v3099_v4 = vld [vmem:[%s4848_s2 + $0xb4] sm:$0xf0]  ;;  %v3085_v5 = vld [vmem:[%s4848_s2 + $0x90] sm:$0xf]  ;;  %v3456_v6 = vld [vmem:[%s4848_s2 + $0x98] sm:$0xf0] }
   0xe   : > { %v3102_v7 = vor.u32 %v3458_v2, %v3099_v4  ;;  %v3455_v8 = vld [vmem:[%s4848_s2 + $0x94] sm:$0xf]  ;;  %v3087_v9 = vld [vmem:[%s4848_s2 + $0x9c] sm:$0xf0]  ;;  %v3086_v10 = vor.u32 %v3456_v6, %v3085_v5  ;;  %v3073_v12 = vld [vmem:[%s4848_s2 + $0x78] sm:$0xf] }
   0xf   : > { %720 = vmatpush.bf16.msra.mxu0 %v3098_v3  ;;  %3541 = vmatpush.bf16.msra.mxu2 %v3098_v3  ;;  %v3090_v11 = vor.u32 %v3455_v8, %v3087_v9  ;;  %v3453_v13 = vld [vmem:[%s4848_s2 + $0x80] sm:$0xf0]  ;;  %v3452_v14 = vld [vmem:[%s4848_s2 + $0x7c] sm:$0xf]  ;;  %v3075_v15 = vld [vmem:[%s4848_s2 + $0x84] sm:$0xf0] }
  0x10   : > { %749 = vmatpush.bf16.msra.mxu1 %v3102_v7  ;;  %v3074_v16 = vor.u32 %v3453_v13, %v3073_v12  ;;  %v3078_v17 = vor.u32 %v3452_v14, %v3075_v15  ;;  %v3061_v18 = vld [vmem:[%s4848_s2 + $0x60] sm:$0xf]  ;;  %v3450_v19 = vld [vmem:[%s4848_s2 + $0x68] sm:$0xf0]  ;;  %v3449_v20 = vld [vmem:[%s4848_s2 + $0x64] sm:$0xf] }
  0x11   : > { %v3063_v21 = vld [vmem:[%s4848_s2 + $0x6c] sm:$0xf0]  ;;  %v3049_v22 = vld [vmem:[%s4848_s2 + $0x48] sm:$0xf]  ;;  %v3447_v23 = vld [vmem:[%s4848_s2 + $0x50] sm:$0xf0]  ;;  %v3062_v24 = vor.u32 %v3450_v19, %v3061_v18 }
  0x12   : > { %v3446_v25 = vld [vmem:[%s4848_s2 + $0x4c] sm:$0xf]  ;;  %v3066_v26 = vor.u32 %v3449_v20, %v3063_v21  ;;  %v3051_v27 = vld [vmem:[%s4848_s2 + $0x54] sm:$0xf0]  ;;  %v3050_v28 = vor.u32 %v3447_v23, %v3049_v22  ;;  %v3037_v30 = vld [vmem:[%s4848_s2 + $0x30] sm:$0xf] }
  0x13   : > { %721 = vmatpush.bf16.msra.mxu0 %v3086_v10  ;;  %3542 = vmatpush.bf16.msra.mxu2 %v3086_v10  ;;  %v3054_v29 = vor.u32 %v3446_v25, %v3051_v27  ;;  %v3444_v31 = vld [vmem:[%s4848_s2 + $0x38] sm:$0xf0]  ;;  %s4874_s18 = smov (!%p526_p3, %s3007_s18), 15  ;;  %v3443_v32 = vld [vmem:[%s4848_s2 + $0x34] sm:$0xf]  ;;  %s4876_s22 = smov (!%p531_p4, %s3739_s22), 1 }
  0x14   : > { %750 = vmatpush.bf16.msra.mxu1 %v3090_v11  ;;  %v3039_v33 = vld [vmem:[%s4848_s2 + $0x3c] sm:$0xf0]  ;;  %v3038_v34 = vor.u32 %v3444_v31, %v3037_v30  ;;  %v3025_v36 = vld [vmem:[%s4848_s2 + $0x18] sm:$0xf]  ;;  %v3441_v37 = vld [vmem:[%s4848_s2 + $0x20] sm:$0xf0] }
  0x15   : > { %v3042_v35 = vor.u32 %v3443_v32, %v3039_v33  ;;  %s3008_s25 = sshll.u32 %s4874_s18, 3  ;;  %v3440_v38 = vld [vmem:[%s4848_s2 + $0x1c] sm:$0xf]  ;;  %v3027_v39 = vld [vmem:[%s4848_s2 + $0x24] sm:$0xf0]  ;;  %v3026_v40 = vor.u32 %v3441_v37, %v3025_v36  ;;  %s3009_s0 = sshll.u32 %s4876_s22, 3 }
  0x16   : > { %s529_s19 = scalar_lea.vmem %s4864_s17, %s3008_s25  ;;  %v3030_v41 = vor.u32 %v3440_v38, %v3027_v39  ;;  %v3013_v42 = vld [vmem:[%s4848_s2] sm:$0xf]  ;;  %v3438_v43 = vld [vmem:[%s4848_s2 + $0x8] sm:$0xf0]  ;;  %v3437_v44 = vld [vmem:[%s4848_s2 + $0x4] sm:$0xf]  ;;  %s3900_s20 = scalar_lea.vmem %s4847_s1, %s3009_s0 }
  0x17   : > { %722 = vmatpush.bf16.msra.mxu0 %v3074_v16  ;;  %3543 = vmatpush.bf16.msra.mxu2 %v3074_v16  ;;  %v3015_v45 = vld [vmem:[%s4848_s2 + $0xc] sm:$0xf0]  ;;  %v3843_v46 = vld [vmem:[%s529_s19] sm:$0xff]  ;;  %v3014_v47 = vor.u32 %v3438_v43, %v3013_v42  ;;  %v3845_v48 = vld [vmem:[%s529_s19 + $0x8] sm:$0xff]  ;;  %v3646_v32 = vmov 0   ;;  %vm1030_vm3 = vcmask 64512  }
  0x18   : > { %751 = vmatpush.bf16.msra.mxu1 %v3078_v17  ;;  %v3847_v49 = vld [vmem:[%s529_s19 + $0x20] sm:$0xff]  ;;  %v3849_v50 = vld [vmem:[%s529_s19 + $0x28] sm:$0xff]  ;;  %v3018_v51 = vor.u32 %v3437_v44, %v3015_v45  ;;  %v3853_v52 = vpack.c.bf16 %v3845_v48, %v3843_v46  ;;  %v3862_v54 = vld [vmem:[%s529_s19 + $0x30] sm:$0xff] }
  0x19   : > { %v3857_v53 = vpack.c.bf16 %v3849_v50, %v3847_v49  ;;  %v3864_v55 = vld [vmem:[%s529_s19 + $0x38] sm:$0xff]  ;;  %v3866_v56 = vld [vmem:[%s529_s19 + $0x10] sm:$0xff]  ;;  %v3886_v60 = vld [vmem:[%s4849_s3] sm:$0x7] }
  0x1a   : > { %v3868_v57 = vld [vmem:[%s529_s19 + $0x18] sm:$0xff]  ;;  %v3872_v58 = vpack.c.bf16 %v3864_v55, %v3862_v54  ;;  %v587_v61 = vperm.slane %v3886_v60, 1  ;;  %v586_v62 = vperm.slane %v3886_v60, 0  ;;  %v3903_v31 = vld [vmem:[%s3900_s20] sm:$0xff] }
  0x1b   : > { %723 = vmatpush.bf16.msra.mxu0 %v3062_v24  ;;  %3544 = vmatpush.bf16.msra.mxu2 %v3062_v24  ;;  %v3876_v59 = vpack.c.bf16 %v3868_v57, %v3866_v56  ;;  %vm990_vm0 = vcmp.gt.f32.partialorder %v3903_v31, 0.0  ;;  %v977_v39 = vrot.slane %v3903_v31, 2 }
  0x1c   : > { %752 = vmatpush.bf16.msra.mxu1 %v3066_v26  ;;  %v998_v33 = vsel %vm990_vm0, 1, %v3646_v32 }
  0x1d   : > { %vm992_vm4 = vcmp.gt.f32.partialorder %v977_v39, 0.0  ;;  %v3448_v39 = vld [vmem:[%s4848_s2 + $0x58] sm:$0xf0] }
  0x1e   : > { %v1000_v45 = vsel %vm992_vm4, 1, %v3646_v32 }
  0x1f   : > { %724 = vmatpush.bf16.msra.mxu0 %v3050_v28  ;;  %3545 = vmatpush.bf16.msra.mxu2 %v3050_v28 }
  0x20   : > { %753 = vmatpush.bf16.msra.mxu1 %v3054_v29 }
  0x23   : > { %725 = vmatpush.bf16.msra.mxu0 %v3038_v34  ;;  %3546 = vmatpush.bf16.msra.mxu2 %v3038_v34  ;;  %v976_v34 = vrot.slane %v3903_v31, 1 }
  0x24   : > { %754 = vmatpush.bf16.msra.mxu1 %v3042_v35  ;;  %v1006_v35 = vperm.slane %v998_v33, 0 }
  0x25   : > { %vm991_vm1 = vcmp.gt.f32.partialorder %v976_v34, 0.0 }
  0x26   : > { %vm1014_vm2 = vcmp.eq.s32.totalorder %v1006_v35, 1  ;;  %v999_v38 = vsel %vm991_vm1, 1, %v3646_v32  ;;  %v982_v35 = vrot.slane %v3903_v31, 7 }
  0x27   : > { %726 = vmatpush.bf16.msra.mxu0 %v3026_v40  ;;  %3547 = vmatpush.bf16.msra.mxu2 %v3026_v40  ;;  %v1007_v42 = vperm.slane %v999_v38, 0  ;;  %v3057_v38 = vld [vmem:[%s4848_s2 + $0x50] sm:$0xf] }
  0x28   : > { %755 = vmatpush.bf16.msra.mxu1 %v3030_v41  ;;  %vm997_vm14 = vcmp.gt.f32.partialorder %v982_v35, 0.0 }
  0x29   : > { %vm1015_vm5 = vcmp.eq.s32.totalorder %v1007_v42, 1 }
  0x2b   : > { %727 = vmatpush.bf16.msra.mxu0 %v3014_v47  ;;  %3548 = vmatpush.bf16.msra.mxu2 %v3014_v47  ;;  %v978_v47 = vrot.slane %v3903_v31, 3 }
  0x2c   : > { %756 = vmatpush.bf16.msra.mxu1 %v3018_v51 }
  0x2d   : > { %vm993_vm6 = vcmp.gt.f32.partialorder %v978_v47, 0.0 }
  0x2e   : > { %728 = vmatmul.bf16.vlgmr.msra.gmra.mxu0 %v3853_v52  ;;  %738 = vmatmul.bf16.vlgmr.msra.gmra.mxu2 %v3857_v53 }
  0x2f   : > { %757 = vmatmul.bf16.vlgmr.msra.gmra.mxu1 %v3853_v52 }
  0x3e   : > { %733 = vmatmul.bf16.gmra.mxu0 %v3876_v59  ;;  %743 = vmatmul.bf16.gmra.mxu2 %v3872_v58 }
  0x3f   : > { %762 = vmatmul.bf16.gmra.mxu1 %v3876_v59 }
  0x4f   : > { %767 = vmatmul.bf16.gmra.mxu1 %v3857_v53 }
  0x5f   : > { %772 = vmatmul.bf16.gmra.mxu1 %v3872_v58 }
  0xab   : > { %v729_v63 = vpop.f32.mrf.mxu0 }
  0xac   : > { %v758_v0 = vpop.f32.mrf.mxu1  ;;  %v730_v2 = vadd.f32 %v729_v63, %v586_v62 }
  0xad   : > { %v759_v1 = vadd.f32 %v758_v0, %v587_v61 }
  0xaf   : > { %822 = vmatpush.xpose.msra.mxu3 %v759_v1  ;;  %v1001_v1 = vsel %vm993_vm6, 1, %v3646_v32 }
  0xb1   : > { %v739_v14 = vpop.f32.mrf.mxu2 }
  0xb2   : > { %823 = vmatmul.f32.vlgmr.msra.gmra.mxu3 %v730_v2  ;;  %v740_v18 = vadd.f32 %v739_v14, %v586_v62  ;;  %v979_v2 = vrot.slane %v3903_v31, 4  ;;  %v3460_v14 = vld [vmem:[%s4848_s2 + $0xb8] sm:$0xf0] }
  0xb3   : > { %v731_v3 = vpop.f32.mrf.mxu0 }
  0xb4   : > { %v760_v4 = vpop.f32.mrf.mxu1  ;;  %v732_v6 = vadd.f32 %v731_v3, %v586_v62  ;;  %vm994_vm8 = vcmp.gt.f32.partialorder %v979_v2, 0.0 }
  0xb5   : > { %v761_v5 = vadd.f32 %v760_v4, %v587_v61 }
  0xb7   : > { %842 = vmatpush.xpose.msrb.mxu3 %v761_v5  ;;  %v1009_v5 = vperm.slane %v1001_v1, 0  ;;  %v3442_v1 = vld [vmem:[%s4848_s2 + $0x28] sm:$0xf0] }
  0xb9   : > { %v741_v19 = vpop.f32.mrf.mxu2  ;;  %vm1017_vm9 = vcmp.eq.s32.totalorder %v1009_v5, 1 }
  0xba   : > { %843 = vmatmul.f32.vlgmr.msrb.gmra.mxu3 %v732_v6  ;;  %v742_v22 = vadd.f32 %v741_v19, %v586_v62 }
  0xbb   : > { %v734_v7 = vpop.f32.mrf.mxu0 }
  0xbc   : > { %v763_v8 = vpop.f32.mrf.mxu1  ;;  %v735_v10 = vadd.f32 %v734_v7, %v586_v62  ;;  %v980_v7 = vrot.slane %v3903_v31, 5 }
  0xbd   : > { %v764_v9 = vadd.f32 %v763_v8, %v587_v61 }
  0xbe   : > { %vm995_vm10 = vcmp.gt.f32.partialorder %v980_v7, 0.0  ;;  %v3439_v7 = vld [vmem:[%s4848_s2 + $0x10] sm:$0xf0] }
  0xbf   : > { %862 = vmatpush.xpose.msra.mxu3 %v764_v9  ;;  %v1002_v9 = vsel %vm994_vm8, 1, %v3646_v32  ;;  %v1003_v19 = vsel %vm995_vm10, 1, %v3646_v32 }
  0xc1   : > { %v744_v23 = vpop.f32.mrf.mxu2 }
  0xc2   : > { %863 = vmatmul.f32.vlgmr.msra.gmra.mxu3 %v735_v10  ;;  %v745_v26 = vadd.f32 %v744_v23, %v586_v62  ;;  %v3081_v23 = vld [vmem:[%s4848_s2 + $0x80] sm:$0xf] }
  0xc3   : > { %v736_v11 = vpop.f32.mrf.mxu0 }
  0xc4   : > { %v765_v12 = vpop.f32.mrf.mxu1  ;;  %v737_v15 = vadd.f32 %v736_v11, %v586_v62 }
  0xc5   : > { %v766_v13 = vadd.f32 %v765_v12, %v587_v61  ;;  %v1010_v12 = vperm.slane %v1002_v9, 0 }
  0xc7   : > { %882 = vmatpush.xpose.msrb.mxu3 %v766_v13  ;;  %v3105_v13 = vld [vmem:[%s4848_s2 + $0xb0] sm:$0xf]  ;;  %vm1018_vm11 = vcmp.eq.s32.totalorder %v1010_v12, 1 }
  0xc9   : > { %v746_v27 = vpop.f32.mrf.mxu2 }
  0xca   : > { %883 = vmatmul.f32.vlgmr.msrb.gmra.mxu3 %v737_v15  ;;  %v747_v30 = vadd.f32 %v746_v27, %v586_v62  ;;  %v1008_v62 = vperm.slane %v1000_v45, 0  ;;  %v3093_v15 = vld [vmem:[%s4848_s2 + $0x98] sm:$0xf]  ;;  %v1011_v27 = vperm.slane %v1003_v19, 0  ;;  %v3445_v45 = vld [vmem:[%s4848_s2 + $0x40] sm:$0xf0] }
  0xcc   : > { %v768_v16 = vpop.f32.mrf.mxu1  ;;  %vm1016_vm7 = vcmp.eq.s32.totalorder %v1008_v62, 1  ;;  %vm1019_vm13 = vcmp.eq.s32.totalorder %v1011_v27, 1 }
  0xcd   : > { %v769_v17 = vadd.f32 %v768_v16, %v587_v61  ;;  %v3106_v16 = vor.u32 %v3460_v14, %v3105_v13 }
  0xcf   : > { %902 = vmatpush.xpose.msra.mxu3 %v769_v17  ;;  %v3457_v17 = vld [vmem:[%s4848_s2 + $0xa0] sm:$0xf0]  ;;  %778 = vmatpush.bf16.msrb.mxu2 %v3106_v16 }
  0xd2   : > { %903 = vmatmul.f32.vlgmr.msra.gmra.mxu3 %v740_v18 }
  0xd4   : > { %v770_v20 = vpop.f32.mrf.mxu1 }
  0xd5   : > { %v771_v21 = vadd.f32 %v770_v20, %v587_v61  ;;  %v981_v20 = vrot.slane %v3903_v31, 6  ;;  %v3045_v31 = vld [vmem:[%s4848_s2 + $0x38] sm:$0xf] }
  0xd6   : > { %v3046_v62 = vor.u32 %v3445_v45, %v3045_v31 }
  0xd7   : > { %922 = vmatpush.xpose.msrb.mxu3 %v771_v21  ;;  %v3094_v21 = vor.u32 %v3457_v17, %v3093_v15  ;;  %vm996_vm12 = vcmp.gt.f32.partialorder %v981_v20, 0.0 }
  0xd8   : > { %v1004_v34 = vsel %vm996_vm12, 1, %v3646_v32 }
  0xd9   : > { %779 = vmatpush.bf16.msrb.mxu2 %v3094_v21 }
  0xda   : > { %923 = vmatmul.f32.vlgmr.msrb.gmra.mxu3 %v742_v22 }
  0xdc   : > { %v773_v24 = vpop.f32.mrf.mxu1 }
  0xdd   : > { %v774_v25 = vadd.f32 %v773_v24, %v587_v61  ;;  %v3454_v24 = vld [vmem:[%s4848_s2 + $0x88] sm:$0xf0] }
  0xdf   : > { %942 = vmatpush.xpose.msra.mxu3 %v774_v25 }
  0xe2   : > { %943 = vmatmul.f32.vlgmr.msra.gmra.mxu3 %v745_v26 }
  0xe4   : > { %v775_v28 = vpop.f32.mrf.mxu1 }
  0xe5   : > { %v776_v29 = vadd.f32 %v775_v28, %v587_v61  ;;  %v3082_v28 = vor.u32 %v3454_v24, %v3081_v23 }
  0xe7   : > { %962 = vmatpush.xpose.msrb.mxu3 %v776_v29  ;;  %v3069_v29 = vld [vmem:[%s4848_s2 + $0x68] sm:$0xf]  ;;  %780 = vmatpush.bf16.msrb.mxu2 %v3082_v28 }
  0xea   : > { %963 = vmatmul.f32.vlgmr.msrb.gmra.mxu3 %v747_v30  ;;  %v3451_v30 = vld [vmem:[%s4848_s2 + $0x70] sm:$0xf0] }
 0x135   : > { %v824_v36 = vpop.f32.mrf.mxu3 }
 0x136   : > { %v967_v37 = vmul.f32 0.35355338, %v824_v36  ;;  %v3070_v36 = vor.u32 %v3451_v30, %v3069_v29 }
 0x138   : > { %v3910_v40 = vsel %vm1014_vm2, %v967_v37, -1e+30  ;;  %781 = vmatpush.bf16.msrb.mxu2 %v3070_v36 }
 0x139   : > { %v1031_v41 = vsel %vm1030_vm3, %v3910_v40, -inf }
 0x13a   : > { %1032 = vmax.xlane.f32.xlu0 %v1031_v41 }
 0x13d   : > { %v844_v43 = vpop.f32.mrf.mxu3 }
 0x13e   : > { %v968_v44 = vmul.f32 0.35355338, %v844_v43  ;;  %v1012_v43 = vperm.slane %v1004_v34, 0 }
 0x140   : > { %v3916_v51 = vsel %vm1015_vm5, %v968_v44, -1e+30  ;;  %v3058_v44 = vor.u32 %v3448_v39, %v3057_v38  ;;  %vm1020_vm15 = vcmp.eq.s32.totalorder %v1012_v43, 1 }
 0x141   : > { %v1034_v61 = vsel %vm1030_vm3, %v3916_v51, -inf }
 0x142   : > { %1035 = vmax.xlane.f32.xlu0 %v1034_v61  ;;  %v1005_v61 = vsel %vm997_vm14, 1, %v3646_v32  ;;  %782 = vmatpush.bf16.msrb.mxu2 %v3058_v44  ;;  %v3021_v32 = vld [vmem:[%s4848_s2 + $0x8] sm:$0xf] }
 0x143   : > { %v1013_v5 = vperm.slane %v1005_v61, 0  ;;  %v3022_v9 = vor.u32 %v3439_v7, %v3021_v32 }
 0x145   : > { %v864_v63 = vpop.f32.mrf.mxu3  ;;  %vm1021_vm0 = vcmp.eq.s32.totalorder %v1013_v5, 1 }
 0x146   : > { %v969_v0 = vmul.f32 0.35355338, %v864_v63  ;;  %783 = vmatpush.bf16.msrb.mxu2 %v3046_v62  ;;  %v4042_v62 = vperm.slane %v3886_v60, 2 }
 0x148   : > { %v3922_v3 = vsel %vm1016_vm7, %v969_v0, -1e+30  ;;  %v3033_v0 = vld [vmem:[%s4848_s2 + $0x20] sm:$0xf] }
 0x149   : > { %v1037_v4 = vsel %vm1030_vm3, %v3922_v3, -inf }
 0x14a   : > { %1038 = vmax.xlane.f32.xlu1 %v1037_v4 }
 0x14d   : > { %v884_v6 = vpop.f32.mrf.mxu3 }
 0x14e   : > { %v970_v8 = vmul.f32 0.35355338, %v884_v6  ;;  %v3034_v6 = vor.u32 %v3442_v1, %v3033_v0 }
 0x150   : > { %v3928_v10 = vsel %vm1017_vm9, %v970_v8, -1e+30  ;;  %784 = vmatpush.bf16.msrb.mxu2 %v3034_v6 }
 0x151   : > { %v1040_v11 = vsel %vm1030_vm3, %v3928_v10, -inf }
 0x152   : > { %1041 = vmax.xlane.f32.xlu1 %v1040_v11 }
 0x154   : > { %785 = vmatpush.bf16.msrb.mxu2 %v3022_v9 }
 0x155   : > { %v904_v18 = vpop.f32.mrf.mxu3 }
 0x156   : > { %v971_v22 = vmul.f32 0.35355338, %v904_v18 }
 0x157   : > { %786 = vmatmul.bf16.vlgmr.msrb.gmra.mxu2 %v3853_v52 }
 0x158   : > { %v3952_v25 = vsel %vm1018_vm11, %v971_v22, -1e+30 }
 0x159   : > { %v1043_v26 = vsel %vm1030_vm3, %v3952_v25, -inf }
 0x15a   : > { %1044 = vmax.xlane.f32.xlu2 %v1043_v26 }
 0x15d   : > { %v924_v33 = vpop.f32.mrf.mxu3 }
 0x15e   : > { %v972_v37 = vmul.f32 0.35355338, %v924_v33 }
 0x160   : > { %v3970_v41 = vsel %vm1019_vm13, %v972_v37, -1e+30 }
 0x161   : > { %v1046_v42 = vsel %vm1030_vm3, %v3970_v41, -inf }
 0x162   : > { %1047 = vmax.xlane.f32.xlu2 %v1046_v42 }
 0x165   : > { %v944_v47 = vpop.f32.mrf.mxu3 }
 0x166   : > { %v973_v63 = vmul.f32 0.35355338, %v944_v47 }
 0x167   : > { %791 = vmatmul.bf16.gmra.mxu2 %v3876_v59 }
 0x168   : > { %v3987_v2 = vsel %vm1020_vm15, %v973_v63, -1e+30 }
 0x169   : > { %v1049_v4 = vsel %vm1030_vm3, %v3987_v2, -inf }
 0x16a   : > { %1050 = vmax.xlane.f32.xlu1 %v1049_v4 }
 0x16d   : > { %v964_v8 = vpop.f32.mrf.mxu3 }
 0x16e   : > { %v974_v11 = vmul.f32 0.35355338, %v964_v8 }
 0x170   : > { %v1029_v12 = vsel %vm1021_vm0, %v974_v11, -1e+30 }
 0x171   : > { %v1052_v13 = vsel %vm1030_vm3, %v1029_v12, -inf }
 0x172   : > { %1053 = vmax.xlane.f32.xlu2 %v1052_v13 }
 0x177   : > { %796 = vmatmul.bf16.gmra.mxu2 %v3857_v53 }
 0x187   : > { %801 = vmatmul.bf16.gmra.mxu2 %v3872_v58 }
 0x1ad   : > { %v1033_v14 = vpop.xlane.xlu0 %1032 }
 0x1ae   : > { %v1055_v15 = vsub.f32 %v3910_v40, %v1033_v14 }
 0x1b0   : > { %v1063_v16 = vmul.f32 1.442695, %v1055_v15 }
 0x1b2   : > { %3569 = vpow2.f32 %v1063_v16 }
 0x1b5   : > { %v1036_v17 = vpop.xlane.xlu0 %1035 }
 0x1b6   : > { %v1056_v18 = vsub.f32 %v3916_v51, %v1036_v17 }
 0x1b8   : > { %v4004_v19 = vpop.eup %3569  ;;  %v1065_v20 = vmul.f32 1.442695, %v1056_v18 }
 0x1b9   : > { %v1079_v52 = vsel %vm1030_vm3, %v4004_v19, 0.0 }
 0x1ba   : > { %3571 = vpow2.f32 %v1065_v20  ;;  %1080 = vadd.xlane.f32.xlu0 %v1079_v52 }
 0x1bd   : > { %v1039_v59 = vpop.xlane.xlu1 %1038 }
 0x1be   : > { %v1057_v53 = vsub.f32 %v3922_v3, %v1039_v59 }
 0x1c0   : > { %v4009_v58 = vpop.eup %3571  ;;  %v1067_v21 = vmul.f32 1.442695, %v1057_v53 }
 0x1c1   : > { %v1082_v40 = vsel %vm1030_vm3, %v4009_v58, 0.0 }
 0x1c2   : > { %3573 = vpow2.f32 %v1067_v21  ;;  %1083 = vadd.xlane.f32.xlu0 %v1082_v40 }
 0x1c5   : > { %v1042_v51 = vpop.xlane.xlu1 %1041 }
 0x1c6   : > { %v1058_v22 = vsub.f32 %v3928_v10, %v1042_v51 }
 0x1c8   : > { %v4014_v23 = vpop.eup %3573  ;;  %v1069_v24 = vmul.f32 1.442695, %v1058_v22 }
 0x1c9   : > { %v1085_v26 = vsel %vm1030_vm3, %v4014_v23, 0.0 }
 0x1ca   : > { %3575 = vpow2.f32 %v1069_v24  ;;  %1086 = vadd.xlane.f32.xlu1 %v1085_v26 }
 0x1cd   : > { %v1045_v3 = vpop.xlane.xlu2 %1044 }
 0x1ce   : > { %v1059_v27 = vsub.f32 %v3952_v25, %v1045_v3 }
 0x1d0   : > { %v4019_v28 = vpop.eup %3575  ;;  %v1071_v29 = vmul.f32 1.442695, %v1059_v27 }
 0x1d1   : > { %v1088_v30 = vsel %vm1030_vm3, %v4019_v28, 0.0 }
 0x1d2   : > { %3577 = vpow2.f32 %v1071_v29  ;;  %1089 = vadd.xlane.f32.xlu2 %v1088_v30 }
 0x1d5   : > { %v1048_v10 = vpop.xlane.xlu2 %1047 }
 0x1d6   : > { %v1060_v33 = vsub.f32 %v3970_v41, %v1048_v10 }
 0x1d8   : > { %v4024_v34 = vpop.eup %3577  ;;  %v1073_v35 = vmul.f32 1.442695, %v1060_v33 }
 0x1d9   : > { %v1091_v36 = vsel %vm1030_vm3, %v4024_v34, 0.0 }
 0x1da   : > { %3579 = vpow2.f32 %v1073_v35  ;;  %1092 = vadd.xlane.f32.xlu0 %v1091_v36  ;;  %v787_v63 = vpop.f32.mrf.mxu2 }
 0x1db   : > { %v788_v0 = vadd.f32 %v787_v63, %v4042_v62 }
 0x1dd   : > { %v1051_v25 = vpop.xlane.xlu1 %1050  ;;  %1249 = vmatpush.msra.mxu3 %v788_v0 }
 0x1de   : > { %v1061_v37 = vsub.f32 %v3987_v2, %v1051_v25 }
 0x1e0   : > { %v4029_v38 = vpop.eup %3579  ;;  %v1075_v39 = vmul.f32 1.442695, %v1061_v37 }
 0x1e1   : > { %v1094_v42 = vsel %vm1030_vm3, %v4029_v38, 0.0 }
 0x1e2   : > { %3581 = vpow2.f32 %v1075_v39  ;;  %1095 = vadd.xlane.f32.xlu1 %v1094_v42  ;;  %v789_v1 = vpop.f32.mrf.mxu2 }
 0x1e3   : > { %v790_v2 = vadd.f32 %v789_v1, %v4042_v62 }
 0x1e5   : > { %v1054_v41 = vpop.xlane.xlu2 %1053  ;;  %1272 = vmatpush.msrb.mxu3 %v790_v2 }
 0x1e6   : > { %v1062_v43 = vsub.f32 %v1029_v12, %v1054_v41 }
 0x1e8   : > { %v4033_v44 = vpop.eup %3581  ;;  %v1077_v31 = vmul.f32 1.442695, %v1062_v43 }
 0x1e9   : > { %v1097_v45 = vsel %vm1030_vm3, %v4033_v44, 0.0 }
 0x1ea   : > { %3583 = vpow2.f32 %v1077_v31  ;;  %1098 = vadd.xlane.f32.xlu2 %v1097_v45  ;;  %v792_v4 = vpop.f32.mrf.mxu2 }
 0x1eb   : > { %v793_v59 = vadd.f32 %v792_v4, %v4042_v62 }
 0x1f0   : > { %v4037_v47 = vpop.eup %3583 }
 0x1f1   : > { %v1100_v61 = vsel %vm1030_vm3, %v4037_v47, 0.0 }
 0x1f2   : > { %1101 = vadd.xlane.f32.xlu0 %v1100_v61  ;;  %v794_v6 = vpop.f32.mrf.mxu2 }
 0x1f3   : > { %v795_v35 = vadd.f32 %v794_v6, %v4042_v62 }
 0x1fa   : > { %v797_v9 = vpop.f32.mrf.mxu2 }
 0x1fb   : > { %v798_v1 = vadd.f32 %v797_v9, %v4042_v62 }
 0x202   : > { %v799_v53 = vpop.f32.mrf.mxu2 }
 0x203   : > { %v800_v51 = vadd.f32 %v799_v53, %v4042_v62 }
 0x205   : > { %1364 = vmatpush.msrb.mxu1 %v800_v51 }
 0x22d   : > { %v1081_v5 = vpop.xlane.xlu0 %1080 }
 0x22e   : > { %3585 = vrcp.f32 %v1081_v5  ;;  %v1114_v60 = vand.u32 2147483648, %v1081_v5  ;;  %v1112_v13 = vand.u32 2147483647, %v1081_v5  ;;  %vm1108_vm2 = vweird.f32 %v1081_v5 }
 0x230   : > { %v1115_v16 = vor.u32 1.1754944e-38, %v1114_v60  ;;  %vm1113_vm5 = vcmp.eq.f32.partialorder %v1112_v13, 8.507059e+37 }
 0x234   : > { %v3586_v32 = vpop.eup %3585 }
 0x235   : > { %v1104_v7 = vmul.f32 %v3586_v32, %v1081_v5  ;;  %v1084_v8 = vpop.xlane.xlu0 %1083  ;;  %vm1109_vm1 = vweird.f32 %v3586_v32 }
 0x236   : > { %3587 = vrcp.f32 %v1084_v8  ;;  %vm1110_vm4 = vmor %vm1108_vm2, %vm1109_vm1  ;;  %v1129_v22 = vand.u32 2147483648, %v1084_v8  ;;  %v1127_v26 = vand.u32 2147483647, %v1084_v8  ;;  %vm1123_vm7 = vweird.f32 %v1084_v8 }
 0x237   : > { %v1105_v11 = vsub.f32 1.0, %v1104_v7 }
 0x238   : > { %v1130_v29 = vor.u32 1.1754944e-38, %v1129_v22  ;;  %vm1128_vm9 = vcmp.eq.f32.partialorder %v1127_v26, 8.507059e+37 }
 0x239   : > { %v1106_v12 = vmul.f32 %v3586_v32, %v1105_v11 }
 0x23b   : > { %v1107_v14 = vadd.f32 %v3586_v32, %v1106_v12 }
 0x23c   : > { %v3588_v15 = vpop.eup %3587 }
 0x23d   : > { %v1111_v17 = vsel %vm1110_vm4, %v3586_v32, %v1107_v14  ;;  %v1119_v18 = vmul.f32 %v3588_v15, %v1084_v8  ;;  %v1087_v20 = vpop.xlane.xlu1 %1086  ;;  %vm1124_vm6 = vweird.f32 %v3588_v15 }
 0x23e   : > { %v1116_v52 = vsel %vm1113_vm5, %v1115_v16, %v1111_v17  ;;  %3589 = vrcp.f32 %v1087_v20  ;;  %vm1125_vm8 = vmor %vm1123_vm7, %vm1124_vm6  ;;  %v1144_v37 = vand.u32 2147483648, %v1087_v20  ;;  %v1142_v42 = vand.u32 2147483647, %v1087_v20 }
 0x23f   : > { %v1120_v21 = vsub.f32 1.0, %v1119_v18  ;;  %v1223_v40 = vmul.f32 %v4004_v19, %v1116_v52  ;;  %vm1138_vm11 = vweird.f32 %v1087_v20 }
 0x240   : > { %v1145_v31 = vor.u32 1.1754944e-38, %v1144_v37  ;;  %vm1143_vm13 = vcmp.eq.f32.partialorder %v1142_v42, 8.507059e+37 }
 0x241   : > { %v1121_v24 = vmul.f32 %v3588_v15, %v1120_v21  ;;  %3107 = vmatmul.msk.f32.vlgmr.msra.gmra.mxu3 %vm1030_vm3, %v1223_v40 }
 0x242   : > { %1295 = vmatpush.msra.mxu3 %v793_v59  ;;  %v3468_v59 = vld [vmem:[%s4850_s4 + $0x38] sm:$0xff] }
 0x243   : > { %v1122_v3 = vadd.f32 %v3588_v15, %v1121_v24  ;;  %1487 = vmatpush.bf16.msrb.mxu0 %v3468_v59 }
 0x244   : > { %v3590_v27 = vpop.eup %3589 }
 0x245   : > { %v1126_v30 = vsel %vm1125_vm8, %v3588_v15, %v1122_v3  ;;  %v1134_v10 = vmul.f32 %v3590_v27, %v1087_v20  ;;  %v1090_v33 = vpop.xlane.xlu2 %1089  ;;  %vm1139_vm10 = vweird.f32 %v3590_v27 }
 0x246   : > { %v1131_v19 = vsel %vm1128_vm9, %v1130_v29, %v1126_v30  ;;  %3591 = vrcp.f32 %v1090_v33  ;;  %vm1140_vm12 = vmor %vm1138_vm11, %vm1139_vm10  ;;  %v1159_v6 = vand.u32 2147483648, %v1090_v33  ;;  %v1157_v7 = vand.u32 2147483647, %v1090_v33 }
 0x247   : > { %v1135_v36 = vsub.f32 1.0, %v1134_v10  ;;  %v1224_v25 = vmul.f32 %v4009_v58, %v1131_v19  ;;  %v802_v58 = vpop.f32.mrf.mxu2  ;;  %vm1153_vm15 = vweird.f32 %v1090_v33  ;;  %v3465_v19 = vld [vmem:[%s4850_s4 + $0x20] sm:$0xff] }
 0x248   : > { %v803_v5 = vadd.f32 %v802_v58, %v4042_v62  ;;  %v1160_v9 = vor.u32 1.1754944e-38, %v1159_v6  ;;  %vm1158_vm1 = vcmp.eq.f32.partialorder %v1157_v7, 8.507059e+37 }
 0x249   : > { %v1136_v39 = vmul.f32 %v3590_v27, %v1135_v36  ;;  %3108 = vmatmul.msk.f32.vlgmr.msrb.gmra.mxu3 %vm1030_vm3, %v1224_v25 }
 0x24a   : > { %1318 = vmatpush.msrb.mxu3 %v795_v35  ;;  %1387 = vmatpush.msra.mxu2 %v803_v5 }
 0x24b   : > { %v1137_v41 = vadd.f32 %v3590_v27, %v1136_v39 }
 0x24c   : > { %v3592_v43 = vpop.eup %3591 }
 0x24d   : > { %v1141_v45 = vsel %vm1140_vm12, %v3590_v27, %v1137_v41  ;;  %v1149_v61 = vmul.f32 %v3592_v43, %v1090_v33  ;;  %v1093_v63 = vpop.xlane.xlu0 %1092  ;;  %vm1154_vm14 = vweird.f32 %v3592_v43  ;;  %v3466_v27 = vld [vmem:[%s4850_s4 + $0x28] sm:$0xff]  ;;  %v3464_v41 = vld [vmem:[%s4850_s4 + $0x18] sm:$0xff] }
 0x24e   : > { %v1146_v0 = vsel %vm1143_vm13, %v1145_v31, %v1141_v45  ;;  %3593 = vrcp.f32 %v1093_v63  ;;  %vm1155_vm0 = vmor %vm1153_vm15, %vm1154_vm14  ;;  %v1174_v18 = vand.u32 2147483648, %v1093_v63  ;;  %v1172_v52 = vand.u32 2147483647, %v1093_v63 }
 0x24f   : > { %v1150_v2 = vsub.f32 1.0, %v1149_v61  ;;  %v1225_v4 = vmul.f32 %v4014_v23, %v1146_v0  ;;  %v804_v14 = vpop.f32.mrf.mxu2  ;;  %vm1168_vm4 = vweird.f32 %v1093_v63 }
 0x250   : > { %v805_v17 = vadd.f32 %v804_v14, %v4042_v62  ;;  %v1175_v62 = vor.u32 1.1754944e-38, %v1174_v18  ;;  %vm1173_vm6 = vcmp.eq.f32.partialorder %v1172_v52, 8.507059e+37 }
 0x251   : > { %v1151_v32 = vmul.f32 %v3592_v43, %v1150_v2  ;;  %3109 = vmatmul.msk.f32.vlgmr.msra.gmra.mxu3 %vm1030_vm3, %v1225_v4 }
 0x252   : > { %1341 = vmatpush.msra.mxu3 %v798_v1 }
 0x253   : > { %v1152_v8 = vadd.f32 %v3592_v43, %v1151_v32 }
 0x254   : > { %v3594_v11 = vpop.eup %3593 }
 0x255   : > { %v1156_v60 = vsel %vm1155_vm0, %v3592_v43, %v1152_v8  ;;  %v1164_v12 = vmul.f32 %v3594_v11, %v1093_v63  ;;  %v1096_v13 = vpop.xlane.xlu1 %1095  ;;  %vm1169_vm2 = vweird.f32 %v3594_v11 }
 0x256   : > { %v1161_v23 = vsel %vm1158_vm1, %v1160_v9, %v1156_v60  ;;  %3595 = vrcp.f32 %v1096_v13  ;;  %vm1170_vm5 = vmor %vm1168_vm4, %vm1169_vm2  ;;  %v1189_v30 = vand.u32 2147483648, %v1096_v13  ;;  %v1187_v10 = vand.u32 2147483647, %v1096_v13 }
 0x257   : > { %v1165_v15 = vsub.f32 1.0, %v1164_v12  ;;  %v1226_v16 = vmul.f32 %v4019_v28, %v1161_v23  ;;  %v3467_v28 = vld [vmem:[%s4850_s4 + $0x30] sm:$0xff]  ;;  %vm1183_vm8 = vweird.f32 %v1096_v13  ;;  %v3461_v23 = vld [vmem:[%s4850_s4] sm:$0xff] }
 0x258   : > { %1488 = vmatpush.bf16.msrb.mxu0 %v3467_v28  ;;  %vm1188_vm10 = vcmp.eq.f32.partialorder %v1187_v10, 8.507059e+37 }
 0x259   : > { %v1166_v20 = vmul.f32 %v3594_v11, %v1165_v15  ;;  %3110 = vmatmul.msk.f32.vlgmr.msrb.gmra.mxu3 %vm1030_vm3, %v1226_v16 }
 0x25a   : > { %1410 = vmatpush.msrb.mxu3 %v805_v17 }
 0x25b   : > { %v1167_v53 = vadd.f32 %v3594_v11, %v1166_v20 }
 0x25c   : > { %v3596_v21 = vpop.eup %3595  ;;  %1489 = vmatpush.bf16.msrb.mxu0 %v3466_v27 }
 0x25d   : > { %v1171_v40 = vsel %vm1170_vm5, %v3594_v11, %v1167_v53  ;;  %v1179_v51 = vmul.f32 %v3596_v21, %v1096_v13  ;;  %v1099_v22 = vpop.xlane.xlu2 %1098  ;;  %vm1184_vm7 = vweird.f32 %v3596_v21  ;;  %v3462_v13 = vld [vmem:[%s4850_s4 + $0x8] sm:$0xff] }
 0x25e   : > { %v1176_v24 = vsel %vm1173_vm6, %v1175_v62, %v1171_v40  ;;  %3597 = vrcp.f32 %v1099_v22  ;;  %vm1185_vm9 = vmor %vm1183_vm8, %vm1184_vm7  ;;  %v1204_v43 = vand.u32 2147483648, %v1099_v22  ;;  %v1202_v61 = vand.u32 2147483647, %v1099_v22  ;;  %v3562_v62 = vld [vmem:[%s4851_s5] ss:$0 sm:$0xff] }
 0x25f   : > { %v1180_v26 = vsub.f32 1.0, %v1179_v51  ;;  %v1227_v3 = vmul.f32 %v4024_v34, %v1176_v24  ;;  %v1190_v34 = vor.u32 1.1754944e-38, %v1189_v30  ;;  %vm1198_vm12 = vweird.f32 %v1099_v22 }
 0x260   : > { %1490 = vmatpush.bf16.msrb.mxu0 %v3465_v19  ;;  %v1205_v1 = vor.u32 1.1754944e-38, %v1204_v43  ;;  %vm1203_vm14 = vcmp.eq.f32.partialorder %v1202_v61, 8.507059e+37 }
 0x261   : > { %v1181_v29 = vmul.f32 %v3596_v21, %v1180_v26  ;;  %3111 = vmatmul.msk.f32.vlgmr.msra.gmra.mxu3 %vm1030_vm3, %v1227_v3 }
 0x263   : > { %v1182_v33 = vadd.f32 %v3596_v21, %v1181_v29 }
 0x264   : > { %v3598_v35 = vpop.eup %3597  ;;  %1491 = vmatpush.bf16.msrb.mxu0 %v3464_v41 }
 0x265   : > { %v1194_v36 = vmul.f32 %v3598_v35, %v1099_v22  ;;  %v1102_v25 = vpop.xlane.xlu0 %1101  ;;  %v1186_v37 = vsel %vm1185_vm9, %v3596_v21, %v1182_v33  ;;  %vm1199_vm11 = vweird.f32 %v3598_v35 }
 0x266   : > { %3599 = vrcp.f32 %v1102_v25  ;;  %v1191_v42 = vsel %vm1188_vm10, %v1190_v34, %v1186_v37  ;;  %vm1200_vm13 = vmor %vm1198_vm12, %vm1199_vm11  ;;  %v1219_v32 = vand.u32 2147483648, %v1102_v25  ;;  %v1217_v7 = vand.u32 2147483647, %v1102_v25 }
 0x267   : > { %v1195_v39 = vsub.f32 1.0, %v1194_v36  ;;  %v1228_v31 = vmul.f32 %v4029_v38, %v1191_v42  ;;  %vm1213_vm0 = vweird.f32 %v1102_v25  ;;  %v3647_v42 = vmov 128.0  }
 0x268   : > { %v1220_v11 = vor.u32 1.1754944e-38, %v1219_v32  ;;  %vm1218_vm2 = vcmp.eq.f32.partialorder %v1217_v7, 8.507059e+37  ;;  %3601 = vrcp.f32 %v3647_v42  ;;  %v3489_v42 = vld [vmem:[%s4854_s8 + $0xa4] sm:$0xf] }
 0x269   : > { %v1196_v45 = vmul.f32 %v3598_v35, %v1195_v39  ;;  %3112 = vmatmul.msk.f32.vlgmr.msrb.gmra.mxu1 %vm1030_vm3, %v1228_v31 }
 0x26b   : > { %v1197_v63 = vadd.f32 %v3598_v35, %v1196_v45 }
 0x26c   : > { %v3600_v0 = vpop.eup %3599 }
 0x26d   : > { %v1201_v58 = vsel %vm1200_vm13, %v3598_v35, %v1197_v63  ;;  %v1209_v2 = vmul.f32 %v3600_v0, %v1102_v25  ;;  %vm1214_vm15 = vweird.f32 %v3600_v0 }
 0x26e   : > { %v1206_v4 = vsel %vm1203_vm14, %v1205_v1, %v1201_v58  ;;  %vm1215_vm1 = vmor %vm1213_vm0, %vm1214_vm15  ;;  %v3602_v41 = vpop.eup %3601 }
 0x26f   : > { %v1210_v5 = vsub.f32 1.0, %v1209_v2  ;;  %v1229_v6 = vmul.f32 %v4033_v44, %v1206_v4  ;;  %v3463_v44 = vld [vmem:[%s4850_s4 + $0x10] sm:$0xff]  ;;  %vm1547_vm4 = vweird.f32 %v3602_v41 }
 0x270   : > { %1492 = vmatpush.bf16.msrb.mxu0 %v3463_v44 }
 0x271   : > { %v1211_v38 = vmul.f32 %v3600_v0, %v1210_v5  ;;  %3113 = vmatmul.msk.f32.vlgmr.msra.gmra.mxu2 %vm1030_vm3, %v1229_v6 }
 0x273   : > { %v1212_v8 = vadd.f32 %v3600_v0, %v1211_v38 }
 0x274   : > { %1493 = vmatpush.bf16.msrb.mxu0 %v3462_v13 }
 0x275   : > { %v1216_v9 = vsel %vm1215_vm1, %v3600_v0, %v1212_v8 }
 0x276   : > { %v1221_v60 = vsel %vm1218_vm2, %v1220_v11, %v1216_v9 }
 0x277   : > { %v1230_v12 = vmul.f32 %v4037_v47, %v1221_v60 }
 0x278   : > { %1494 = vmatpush.bf16.msrb.mxu0 %v3461_v23 }
 0x279   : > { %3114 = vmatmul.msk.f32.vlgmr.msrb.gmra.mxu3 %vm1030_vm3, %v1230_v12 }
 0x2c4   : > { %v1251_v14 = vpop.f32.mrf.mxu3 }
 0x2cc   : > { %v1274_v15 = vpop.f32.mrf.mxu3 }
 0x2cd   : > { %v1415_v47 = vpack.c.bf16 %v1274_v15, %v1251_v14 }
 0x2cf   : > { %1495 = vmatmul.bf16.vlgmr.msrb.gmra.mxu0 %v1415_v47 }
 0x2d4   : > { %v1297_v16 = vpop.f32.mrf.mxu3 }
 0x2dc   : > { %v1320_v17 = vpop.f32.mrf.mxu3 }
 0x2dd   : > { %v1416_v18 = vpack.c.bf16 %v1320_v17, %v1297_v16 }
 0x2df   : > { %1500 = vmatmul.bf16.gmra.mxu0 %v1416_v18 }
 0x2e4   : > { %v1343_v52 = vpop.f32.mrf.mxu3 }
 0x2e6   : > { %v1366_v20 = vpop.f32.mrf.mxu1 }
 0x2e7   : > { %v1417_v59 = vpack.c.bf16 %v1366_v20, %v1343_v52 }
 0x2ef   : > { %1505 = vmatmul.bf16.gmra.mxu0 %v1417_v59  ;;  %v3261_v59 = vld [vmem:[%s4854_s8 + $0xe0] sm:$0xf] }
 0x2f4   : > { %v1389_v53 = vpop.f32.mrf.mxu2 }
 0x2fc   : > { %v1412_v28 = vpop.f32.mrf.mxu3 }
 0x2fd   : > { %v1418_v21 = vpack.c.bf16 %v1412_v28, %v1389_v53  ;;  %v3499_v53 = vld [vmem:[%s4854_s8 + $0xec] sm:$0xf0]  ;;  %v3497_v28 = vld [vmem:[%s4854_s8 + $0xe4] sm:$0xf] }
 0x2ff   : > { %1510 = vmatmul.bf16.gmra.mxu0 %v1418_v21  ;;  %v3262_v21 = vor.u32 %v3499_v53, %v3261_v59 }
 0x301   : > { %1921 = vmatpush.bf16.msra.mxu1 %v3262_v21  ;;  %v3207_v21 = vld [vmem:[%s4854_s8 + $0x78] sm:$0xf0] }
 0x34c   : > { %v1496_v40 = vpop.f32.mrf.mxu0 }
 0x34d   : > { %v1497_v51 = vadd.f32 %v3562_v62, %v1496_v40  ;;  %v3269_v40 = vld [vmem:[%s4854_s8 + $0xe8] sm:$0xf] }
 0x34f   : > { %v1516_v22 = vadd.f32 %v1497_v51, %v3843_v46  ;;  %v3500_v51 = vld [vmem:[%s4854_s8 + $0xf4] sm:$0xf0] }
 0x351   : > { %1526 = vadd.xlane.f32.xlu1 %v1516_v22 }
 0x354   : > { %v1498_v24 = vpop.f32.mrf.mxu0 }
 0x355   : > { %v1499_v26 = vadd.f32 %v3562_v62, %v1498_v24  ;;  %v3270_v24 = vor.u32 %v3500_v51, %v3269_v40  ;;  %v3181_v40 = vld [vmem:[%s4854_s8 + $0x40] sm:$0xf]  ;;  %v3479_v51 = vld [vmem:[%s4854_s8 + $0x4c] sm:$0xf0] }
 0x357   : > { %v1517_v3 = vadd.f32 %v1499_v26, %v3845_v48  ;;  %v3498_v26 = vld [vmem:[%s4854_s8 + $0xec] sm:$0xf]  ;;  %1979 = vmatpush.bf16.msra.mxu3 %v3270_v24  ;;  %v3182_v24 = vor.u32 %v3479_v51, %v3181_v40 }
 0x359   : > { %1528 = vadd.xlane.f32.xlu2 %v1517_v3 }
 0x35c   : > { %v1501_v27 = vpop.f32.mrf.mxu0 }
 0x35d   : > { %v1502_v29 = vadd.f32 %v3562_v62, %v1501_v27 }
 0x35f   : > { %v1518_v30 = vadd.f32 %v1502_v29, %v3866_v56  ;;  %v3245_v29 = vld [vmem:[%s4854_s8 + $0xc0] sm:$0xf] }
 0x361   : > { %1530 = vadd.xlane.f32.xlu0 %v1518_v30 }
 0x364   : > { %v1503_v10 = vpop.f32.mrf.mxu0 }
 0x365   : > { %v1504_v33 = vadd.f32 %v3562_v62, %v1503_v10  ;;  %v3493_v10 = vld [vmem:[%s4854_s8 + $0xc4] sm:$0xf] }
 0x367   : > { %v1519_v19 = vadd.f32 %v1504_v33, %v3868_v57  ;;  %v1543_v57 = vmul.f32 128.0, %v3602_v41 }
 0x369   : > { %1532 = vadd.xlane.f32.xlu1 %v1519_v19  ;;  %v1544_v43 = vsub.f32 1.0, %v1543_v57  ;;  %v3231_v57 = vld [vmem:[%s4854_s8 + $0xb0] sm:$0xf0] }
 0x36b   : > { %v1545_v31 = vmul.f32 %v3602_v41, %v1544_v43  ;;  %v3237_v43 = vld [vmem:[%s4854_s8 + $0xa8] sm:$0xf] }
 0x36c   : > { %v1506_v35 = vpop.f32.mrf.mxu0 }
 0x36d   : > { %v1507_v34 = vadd.f32 %v3562_v62, %v1506_v35  ;;  %v1546_v45 = vadd.f32 %v3602_v41, %v1545_v31  ;;  %v3253_v35 = vld [vmem:[%s4854_s8 + $0xc8] sm:$0xf]  ;;  %v3492_v31 = vld [vmem:[%s4854_s8 + $0xb4] sm:$0xf0] }
 0x36f   : > { %v1520_v46 = vadd.f32 %v1507_v34, %v3847_v49  ;;  %v4102_v49 = vsel %vm1547_vm4, %v3602_v41, %v1546_v45  ;;  %v3496_v34 = vld [vmem:[%s4854_s8 + $0xd4] sm:$0xf0]  ;;  %v3234_v45 = vor.u32 %v3489_v42, %v3231_v57  ;;  %v3175_v57 = vld [vmem:[%s4854_s8 + $0x38] sm:$0xf0] }
 0x371   : > { %1534 = vadd.xlane.f32.xlu2 %v1520_v46 }
 0x374   : > { %v1508_v36 = vpop.f32.mrf.mxu0 }
 0x375   : > { %v1509_v25 = vadd.f32 %v3562_v62, %v1508_v36  ;;  %v3254_v36 = vor.u32 %v3496_v34, %v3253_v35  ;;  %v3165_v35 = vld [vmem:[%s4854_s8 + $0x20] sm:$0xf]  ;;  %v3475_v34 = vld [vmem:[%s4854_s8 + $0x2c] sm:$0xf0] }
 0x377   : > { %v1521_v48 = vadd.f32 %v1509_v25, %v3849_v50  ;;  %v3494_v25 = vld [vmem:[%s4854_s8 + $0xcc] sm:$0xf]  ;;  %1980 = vmatpush.bf16.msra.mxu3 %v3254_v36  ;;  %v3166_v36 = vor.u32 %v3475_v34, %v3165_v35 }
 0x379   : > { %1536 = vadd.xlane.f32.xlu0 %v1521_v48 }
 0x37c   : > { %v1511_v37 = vpop.f32.mrf.mxu0 }
 0x37d   : > { %v1512_v39 = vadd.f32 %v3562_v62, %v1511_v37 }
 0x37f   : > { %v1522_v56 = vadd.f32 %v1512_v39, %v3862_v54  ;;  %v3229_v39 = vld [vmem:[%s4854_s8 + $0xa0] sm:$0xf] }
 0x381   : > { %1538 = vadd.xlane.f32.xlu0 %v1522_v56 }
 0x384   : > { %v1513_v54 = vpop.f32.mrf.mxu0 }
 0x385   : > { %v1514_v58 = vadd.f32 %v3562_v62, %v1513_v54  ;;  %v3263_v62 = vld [vmem:[%s4854_s8 + $0xf0] sm:$0xf0] }
 0x387   : > { %v4113_v5 = vadd.f32 %v1514_v58, %v3864_v55  ;;  %v3487_v58 = vld [vmem:[%s4854_s8 + $0x8c] sm:$0xf0] }
 0x3c4   : > { %v1527_v61 = vpop.xlane.xlu1 %1526 }
 0x3c5   : > { %v1549_v63 = vmul.f32 %v4102_v49, %v1527_v61  ;;  %v3238_v61 = vor.u32 %v3492_v31, %v3237_v43 }
 0x3c7   : > { %v4105_v50 = vsub.f32 %v1516_v22, %v1549_v63  ;;  %v3266_v22 = vor.u32 %v3497_v28, %v3263_v62  ;;  %v3490_v63 = vld [vmem:[%s4854_s8 + $0xac] sm:$0xf]  ;;  %1981 = vmatpush.bf16.msra.mxu3 %v3238_v61  ;;  %v3471_v61 = vld [vmem:[%s4854_s8 + $0xc] sm:$0xf0] }
 0x3c8   : > { %v3482_v28 = vld [vmem:[%s4854_s8 + $0x6c] sm:$0xf] }
 0x3c9   : > { %v1565_v0 = vmul.f32 %v4105_v50, %v4105_v50  ;;  %1950 = vmatpush.bf16.msrb.mxu2 %v3266_v22  ;;  %v3210_v62 = vor.u32 %v3482_v28, %v3207_v21  ;;  %v3477_v22 = vld [vmem:[%s4854_s8 + $0x44] sm:$0xf] }
 0x3cb   : > { %1573 = vadd.xlane.f32.xlu1 %v1565_v0  ;;  %v3239_v0 = vld [vmem:[%s4854_s8 + $0xb8] sm:$0xf0] }
 0x3cc   : > { %v1529_v1 = vpop.xlane.xlu2 %1528  ;;  %v3242_v54 = vor.u32 %v3490_v63, %v3239_v0  ;;  %v3469_v63 = vld [vmem:[%s4854_s8 + $0x4] sm:$0xf] }
 0x3cd   : > { %v1550_v2 = vmul.f32 %v4102_v49, %v1529_v1  ;;  %v3213_v1 = vld [vmem:[%s4854_s8 + $0x80] sm:$0xf] }
 0x3cf   : > { %v4110_v4 = vsub.f32 %v1517_v3, %v1550_v2  ;;  %v3271_v3 = vld [vmem:[%s4854_s8 + $0xf8] sm:$0xf0]  ;;  %v3485_v2 = vld [vmem:[%s4854_s8 + $0x84] sm:$0xf] }
 0x3d0   : > { %v3274_v27 = vor.u32 %v3498_v26, %v3271_v3  ;;  %v3183_v26 = vld [vmem:[%s4854_s8 + $0x50] sm:$0xf0]  ;;  %v3189_v3 = vld [vmem:[%s4854_s8 + $0x48] sm:$0xf] }
 0x3d1   : > { %v1566_v6 = vmul.f32 %v4110_v4, %v4110_v4 }
 0x3d2   : > { %2008 = vmatpush.bf16.msra.mxu0 %v3274_v27  ;;  %v3480_v27 = vld [vmem:[%s4854_s8 + $0x54] sm:$0xf0] }
 0x3d3   : > { %1540 = vadd.xlane.f32.xlu1 %v4113_v5  ;;  %1575 = vadd.xlane.f32.xlu2 %v1566_v6  ;;  %v3214_v6 = vor.u32 %v3487_v58, %v3213_v1  ;;  %v3151_v1 = vld [vmem:[%s4854_s8 + $0x10] sm:$0xf0]  ;;  %v3157_v58 = vld [vmem:[%s4854_s8 + $0x8] sm:$0xf] }
 0x3d4   : > { %v1531_v32 = vpop.xlane.xlu0 %1530 }
 0x3d5   : > { %v1551_v38 = vmul.f32 %v4102_v49, %v1531_v32  ;;  %v3215_v32 = vld [vmem:[%s4854_s8 + $0x90] sm:$0xf0] }
 0x3d7   : > { %v4119_v7 = vsub.f32 %v1518_v30, %v1551_v38  ;;  %v3495_v30 = vld [vmem:[%s4854_s8 + $0xcc] sm:$0xf0]  ;;  %v3221_v38 = vld [vmem:[%s4854_s8 + $0x88] sm:$0xf] }
 0x3d8   : > { %v3246_v33 = vor.u32 %v3495_v30, %v3245_v29  ;;  %v3186_v29 = vor.u32 %v3477_v22, %v3183_v26  ;;  %v3190_v30 = vor.u32 %v3480_v27, %v3189_v3 }
 0x3d9   : > { %v1567_v8 = vmul.f32 %v4119_v7, %v4119_v7 }
 0x3da   : > { %1922 = vmatpush.bf16.msra.mxu1 %v3246_v33  ;;  %v3191_v33 = vld [vmem:[%s4854_s8 + $0x58] sm:$0xf0] }
 0x3db   : > { %1577 = vadd.xlane.f32.xlu2 %v1567_v8  ;;  %v3488_v8 = vld [vmem:[%s4854_s8 + $0x94] sm:$0xf0] }
 0x3dc   : > { %v1533_v11 = vpop.xlane.xlu1 %1532 }
 0x3dd   : > { %v1552_v9 = vmul.f32 %v4102_v49, %v1533_v11  ;;  %v3218_v11 = vor.u32 %v3485_v2, %v3215_v32  ;;  %v3154_v2 = vor.u32 %v3469_v63, %v3151_v1  ;;  %v3470_v32 = vld [vmem:[%s4854_s8 + $0xc] sm:$0xf] }
 0x3df   : > { %v4124_v55 = vsub.f32 %v1519_v19, %v1552_v9  ;;  %v3247_v19 = vld [vmem:[%s4854_s8 + $0xd0] sm:$0xf0]  ;;  %v3222_v9 = vor.u32 %v3488_v8, %v3221_v38  ;;  %v3159_v38 = vld [vmem:[%s4854_s8 + $0x18] sm:$0xf0] }
 0x3e1   : > { %v1568_v60 = vmul.f32 %v4124_v55, %v4124_v55  ;;  %1982 = vmatpush.bf16.msra.mxu3 %v3222_v9 }
 0x3e3   : > { %1579 = vadd.xlane.f32.xlu0 %v1568_v60  ;;  %v3486_v60 = vld [vmem:[%s4854_s8 + $0x8c] sm:$0xf] }
 0x3e4   : > { %v1535_v12 = vpop.xlane.xlu2 %1534 }
 0x3e5   : > { %v1553_v44 = vmul.f32 %v4102_v49, %v1535_v12  ;;  %v3223_v12 = vld [vmem:[%s4854_s8 + $0x98] sm:$0xf0] }
 0x3e7   : > { %v4129_v13 = vsub.f32 %v1520_v46, %v1553_v44  ;;  %v3250_v46 = vor.u32 %v3493_v10, %v3247_v19  ;;  %v3226_v44 = vor.u32 %v3486_v60, %v3223_v12  ;;  %v3478_v10 = vld [vmem:[%s4854_s8 + $0x4c] sm:$0xf] }
 0x3e8   : > { %v3194_v19 = vor.u32 %v3478_v10, %v3191_v33  ;;  %v4349_v33 = vld [vmem:[%s4852_s6] ss:$0 sm:$0xff] }
 0x3e9   : > { %v1569_v23 = vmul.f32 %v4129_v13, %v4129_v13  ;;  %1951 = vmatpush.bf16.msrb.mxu2 %v3250_v46  ;;  %v3473_v46 = vld [vmem:[%s4854_s8 + $0x24] sm:$0xf] }
 0x3eb   : > { %1581 = vadd.xlane.f32.xlu1 %v1569_v23  ;;  %v3197_v23 = vld [vmem:[%s4854_s8 + $0x60] sm:$0xf] }
 0x3ec   : > { %v1537_v14 = vpop.xlane.xlu0 %1536 }
 0x3ed   : > { %v1554_v15 = vmul.f32 %v4102_v49, %v1537_v14  ;;  %1952 = vmatpush.bf16.msrb.mxu2 %v3234_v45  ;;  %v3483_v14 = vld [vmem:[%s4854_s8 + $0x6c] sm:$0xf0]  ;;  %v3149_v45 = vld [vmem:[%s4854_s8] sm:$0xf] }
 0x3ef   : > { %v4134_v47 = vsub.f32 %v1521_v48, %v1554_v15  ;;  %v3255_v48 = vld [vmem:[%s4854_s8 + $0xd8] sm:$0xf0]  ;;  %v3481_v15 = vld [vmem:[%s4854_s8 + $0x64] sm:$0xf] }
 0x3f0   : > { %v3258_v37 = vor.u32 %v3494_v25, %v3255_v48  ;;  %v3167_v25 = vld [vmem:[%s4854_s8 + $0x30] sm:$0xf0]  ;;  %v3173_v48 = vld [vmem:[%s4854_s8 + $0x28] sm:$0xf] }
 0x3f1   : > { %v1570_v16 = vmul.f32 %v4134_v47, %v4134_v47  ;;  %1953 = vmatpush.bf16.msrb.mxu2 %v3218_v11  ;;  %v3162_v11 = vor.u32 %v3470_v32, %v3159_v38 }
 0x3f2   : > { %2009 = vmatpush.bf16.msra.mxu0 %v3258_v37  ;;  %v3476_v37 = vld [vmem:[%s4854_s8 + $0x34] sm:$0xf0] }
 0x3f3   : > { %1583 = vadd.xlane.f32.xlu2 %v1570_v16  ;;  %v3198_v16 = vor.u32 %v3483_v14, %v3197_v23  ;;  %v3174_v42 = vor.u32 %v3476_v37, %v3173_v48 }
 0x3f4   : > { %v1539_v17 = vpop.xlane.xlu0 %1538 }
 0x3f5   : > { %v1555_v18 = vmul.f32 %v4102_v49, %v1539_v17  ;;  %v3199_v17 = vld [vmem:[%s4854_s8 + $0x70] sm:$0xf0] }
 0x3f6   : > { %2010 = vmatpush.bf16.msra.mxu0 %v3242_v54  ;;  %v3202_v59 = vor.u32 %v3481_v15, %v3199_v17  ;;  %v3150_v54 = vor.u32 %v3471_v61, %v3149_v45 }
 0x3f7   : > { %v4139_v20 = vsub.f32 %v1522_v56, %v1555_v18  ;;  %v3491_v56 = vld [vmem:[%s4854_s8 + $0xac] sm:$0xf0]  ;;  %v3205_v18 = vld [vmem:[%s4854_s8 + $0x68] sm:$0xf] }
 0x3f8   : > { %v3230_v41 = vor.u32 %v3491_v56, %v3229_v39  ;;  %1954 = vmatpush.bf16.msrb.mxu2 %v3202_v59  ;;  %v3170_v56 = vor.u32 %v3473_v46, %v3167_v25 }
 0x3f9   : > { %v1571_v52 = vmul.f32 %v4139_v20, %v4139_v20 }
 0x3fa   : > { %1923 = vmatpush.bf16.msra.mxu1 %v3230_v41  ;;  %2011 = vmatpush.bf16.msra.mxu0 %v3226_v44  ;;  %v3474_v41 = vld [vmem:[%s4854_s8 + $0x2c] sm:$0xf] }
 0x3fb   : > { %1585 = vadd.xlane.f32.xlu0 %v1571_v52  ;;  %v3484_v52 = vld [vmem:[%s4854_s8 + $0x74] sm:$0xf0]  ;;  %v3178_v31 = vor.u32 %v3474_v41, %v3175_v57 }
 0x3fc   : > { %v3206_v53 = vor.u32 %v3484_v52, %v3205_v18  ;;  %1955 = vmatpush.bf16.msrb.mxu2 %v3186_v29 }
 0x3fe   : > { %1924 = vmatpush.bf16.msra.mxu1 %v3214_v6  ;;  %1983 = vmatpush.bf16.msra.mxu3 %v3206_v53  ;;  %v3472_v6 = vld [vmem:[%s4854_s8 + $0x14] sm:$0xf0] }
 0x3ff   : > { %2012 = vmatpush.bf16.msra.mxu0 %v3210_v62  ;;  %v3158_v8 = vor.u32 %v3472_v6, %v3157_v58 }
 0x400   : > { %1956 = vmatpush.bf16.msrb.mxu2 %v3170_v56 }
 0x402   : > { %1925 = vmatpush.bf16.msra.mxu1 %v3198_v16  ;;  %1984 = vmatpush.bf16.msra.mxu3 %v3190_v30 }
 0x403   : > { %2013 = vmatpush.bf16.msra.mxu0 %v3194_v19 }
 0x404   : > { %1957 = vmatpush.bf16.msrb.mxu2 %v3154_v2 }
 0x406   : > { %1926 = vmatpush.bf16.msra.mxu1 %v3182_v24  ;;  %1985 = vmatpush.bf16.msra.mxu3 %v3174_v42 }
 0x407   : > { %2014 = vmatpush.bf16.msra.mxu0 %v3178_v31 }
 0x40a   : > { %1927 = vmatpush.bf16.msra.mxu1 %v3166_v36  ;;  %1986 = vmatpush.bf16.msra.mxu3 %v3158_v8 }
 0x40b   : > { %2015 = vmatpush.bf16.msra.mxu0 %v3162_v11 }
 0x40e   : > { %1928 = vmatpush.bf16.msra.mxu1 %v3150_v54 }
 0x43e   : > { %v1574_v39 = vpop.xlane.xlu1 %1573 }
 0x43f   : > { %v1589_v43 = vmul.f32 %v1574_v39, %v4102_v49 }
 0x441   : > { %v1597_v0 = vadd.f32 1e-05, %v1589_v43 }
 0x443   : > { %3603 = vrsqrt.f32 %v1597_v0  ;;  %vm1611_vm6 = vweird.f32 %v1597_v0 }
 0x446   : > { %v1541_v9 = vpop.xlane.xlu1 %1540  ;;  %v1576_v60 = vpop.xlane.xlu2 %1575 }
 0x447   : > { %v1556_v12 = vmul.f32 %v4102_v49, %v1541_v9  ;;  %v1590_v44 = vmul.f32 %v1576_v60, %v4102_v49 }
 0x449   : > { %v3604_v23 = vpop.eup %3603  ;;  %v4339_v14 = vsub.f32 %v4113_v5, %v1556_v12  ;;  %v1598_v15 = vadd.f32 1e-05, %v1590_v44 }
 0x44a   : > { %v1606_v16 = vmul.f32 %v3604_v23, %v1597_v0  ;;  %vm1612_vm5 = vweird.f32 %v3604_v23 }
 0x44b   : > { %3605 = vrsqrt.f32 %v1598_v15  ;;  %v1572_v17 = vmul.f32 %v4339_v14, %v4339_v14  ;;  %vm1613_vm7 = vmor %vm1611_vm6, %vm1612_vm5  ;;  %vm1621_vm9 = vweird.f32 %v1598_v15 }
 0x44c   : > { %v1607_v18 = vmul.f32 %v3604_v23, %v1606_v16 }
 0x44d   : > { %1587 = vadd.xlane.f32.xlu1 %v1572_v17 }
 0x44e   : > { %v1608_v52 = vmul.f32 0.5, %v1607_v18  ;;  %v1578_v59 = vpop.xlane.xlu2 %1577 }
 0x44f   : > { %v1591_v53 = vmul.f32 %v1578_v59, %v4102_v49 }
 0x450   : > { %v1609_v28 = vsub.f32 1.5, %v1608_v52 }
 0x451   : > { %v3606_v21 = vpop.eup %3605  ;;  %v1599_v62 = vadd.f32 1e-05, %v1591_v53 }
 0x452   : > { %v1610_v40 = vmul.f32 %v3604_v23, %v1609_v28  ;;  %v1616_v51 = vmul.f32 %v3606_v21, %v1598_v15  ;;  %vm1622_vm8 = vweird.f32 %v3606_v21 }
 0x453   : > { %3607 = vrsqrt.f32 %v1599_v62  ;;  %vm1623_vm10 = vmor %vm1621_vm9, %vm1622_vm8  ;;  %vm1631_vm12 = vweird.f32 %v1599_v62 }
 0x454   : > { %v1617_v5 = vmul.f32 %v3606_v21, %v1616_v51  ;;  %v1614_v22 = vsel %vm1613_vm7, %v3604_v23, %v1610_v40 }
 0x455   : > { %v1685_v30 = vmul.f32 %v1614_v22, %v4105_v50  ;;  %v4356_v50 = vld [vmem:[%s4853_s7] ss:$0 sm:$0xff] }
 0x456   : > { %v1618_v24 = vmul.f32 0.5, %v1617_v5  ;;  %v1580_v26 = vpop.xlane.xlu0 %1579 }
 0x457   : > { %v1592_v3 = vmul.f32 %v1580_v26, %v4102_v49  ;;  %v1696_v25 = vmul.f32 %v4349_v33, %v1685_v30 }
 0x458   : > { %v1619_v27 = vsub.f32 1.5, %v1618_v24 }
 0x459   : > { %v3608_v29 = vpop.eup %3607  ;;  %v1600_v10 = vadd.f32 1e-05, %v1592_v3  ;;  %v4361_v43 = vadd.f32 %v4356_v50, %v1696_v25  ;;  %v3506_v25 = vld [vmem:[%s4856_s10 + $0x28] sm:$0xff] }
 0x45a   : > { %v1620_v19 = vmul.f32 %v3606_v21, %v1619_v27  ;;  %v1626_v35 = vmul.f32 %v3608_v29, %v1599_v62  ;;  %vm1632_vm11 = vweird.f32 %v3608_v29 }
 0x45b   : > { %3609 = vrsqrt.f32 %v1600_v10  ;;  %vm1633_vm13 = vmor %vm1631_vm12, %vm1632_vm11  ;;  %vm1641_vm15 = vweird.f32 %v1600_v10 }
 0x45c   : > { %v1624_v34 = vsel %vm1623_vm10, %v3606_v21, %v1620_v19  ;;  %v1627_v46 = vmul.f32 %v3608_v29, %v1626_v35  ;;  %v3532_v19 = vld [vmem:[%s4856_s10 + $0xf8] sm:$0xff]  ;;  %v3507_v35 = vld [vmem:[%s4856_s10 + $0x30] sm:$0xff] }
 0x45d   : > { %v1686_v36 = vmul.f32 %v1624_v34, %v4110_v4  ;;  %2432 = vmatpush.bf16.msrb.mxu0 %v3532_v19  ;;  %v3531_v34 = vld [vmem:[%s4856_s10 + $0xf0] sm:$0xff] }
 0x45e   : > { %v1628_v48 = vmul.f32 0.5, %v1627_v46  ;;  %v1582_v37 = vpop.xlane.xlu1 %1581  ;;  %v3516_v46 = vld [vmem:[%s4856_s10 + $0x78] sm:$0xff] }
 0x45f   : > { %v1593_v39 = vmul.f32 %v1582_v37, %v4102_v49  ;;  %v1697_v56 = vmul.f32 %v4349_v33, %v1686_v36  ;;  %v3524_v36 = vld [vmem:[%s4856_s10 + $0xb8] sm:$0xff]  ;;  %2374 = vmatpush.bf16.msra.mxu2 %v3516_v46 }
 0x460   : > { %v1629_v42 = vsub.f32 1.5, %v1628_v48  ;;  %v3530_v48 = vld [vmem:[%s4856_s10 + $0xe8] sm:$0xff]  ;;  %2403 = vmatpush.bf16.msrb.mxu3 %v3524_v36 }
 0x461   : > { %v3610_v41 = vpop.eup %3609  ;;  %v1601_v57 = vadd.f32 1e-05, %v1593_v39  ;;  %v4364_v4 = vadd.f32 %v4356_v50, %v1697_v56  ;;  %2433 = vmatpush.bf16.msrb.mxu0 %v3531_v34  ;;  %v3515_v39 = vld [vmem:[%s4856_s10 + $0x70] sm:$0xff] }
 0x462   : > { %v1630_v31 = vmul.f32 %v3608_v29, %v1629_v42  ;;  %v1636_v45 = vmul.f32 %v3610_v41, %v1600_v10  ;;  %vm1642_vm14 = vweird.f32 %v3610_v41  ;;  %v3508_v10 = vld [vmem:[%s4856_s10 + $0x38] sm:$0xff]  ;;  %v3523_v56 = vld [vmem:[%s4856_s10 + $0xb0] sm:$0xff]  ;;  %v3505_v42 = vld [vmem:[%s4856_s10 + $0x20] sm:$0xff] }
 0x463   : > { %3611 = vrsqrt.f32 %v1601_v57  ;;  %v1715_v61 = vpack.c.bf16 %v4364_v4, %v4361_v43  ;;  %vm1643_vm0 = vmor %vm1641_vm15, %vm1642_vm14  ;;  %vm1651_vm2 = vweird.f32 %v1601_v57  ;;  %2345 = vmatpush.bf16.msrb.mxu1 %v3508_v10  ;;  %2375 = vmatpush.bf16.msra.mxu2 %v3515_v39 }
 0x464   : > { %v1637_v63 = vmul.f32 %v3610_v41, %v1636_v45  ;;  %v1634_v0 = vsel %vm1633_vm13, %v3608_v29, %v1630_v31  ;;  %2404 = vmatpush.bf16.msrb.mxu3 %v3523_v56  ;;  %v3514_v31 = vld [vmem:[%s4856_s10 + $0x68] sm:$0xff] }
 0x465   : > { %1929 = vmatmul.bf16.vlgmr.msra.gmra.mxu1 %v1715_v61  ;;  %1958 = vmatmul.bf16.vlgmr.msrb.gmra.mxu2 %v1715_v61  ;;  %v1687_v32 = vmul.f32 %v1634_v0, %v4119_v7  ;;  %v3522_v45 = vld [vmem:[%s4856_s10 + $0xa8] sm:$0xff] }
 0x466   : > { %v1638_v54 = vmul.f32 0.5, %v1637_v63  ;;  %1987 = vmatmul.bf16.vlgmr.msra.gmra.mxu3 %v1715_v61  ;;  %2016 = vmatmul.bf16.vlgmr.msra.gmra.mxu0 %v1715_v61  ;;  %v1584_v1 = vpop.xlane.xlu2 %1583 }
 0x467   : > { %v1594_v58 = vmul.f32 %v1584_v1, %v4102_v49  ;;  %v1698_v44 = vmul.f32 %v4349_v33, %v1687_v32  ;;  %2346 = vmatpush.bf16.msrb.mxu1 %v3507_v35  ;;  %2434 = vmatpush.bf16.msrb.mxu0 %v3530_v48  ;;  %v3528_v1 = vld [vmem:[%s4856_s10 + $0xd8] sm:$0xff] }
 0x468   : > { %v1639_v2 = vsub.f32 1.5, %v1638_v54  ;;  %2376 = vmatpush.bf16.msra.mxu2 %v3514_v31  ;;  %2405 = vmatpush.bf16.msrb.mxu3 %v3522_v45  ;;  %v3504_v54 = vld [vmem:[%s4856_s10 + $0x18] sm:$0xff] }
 0x469   : > { %v3612_v6 = vpop.eup %3611  ;;  %v1602_v38 = vadd.f32 1e-05, %v1594_v58  ;;  %v4374_v18 = vadd.f32 %v4356_v50, %v1698_v44  ;;  %v3526_v44 = vld [vmem:[%s4856_s10 + $0xc8] sm:$0xff] }
 0x46a   : > { %v1640_v8 = vmul.f32 %v3610_v41, %v1639_v2  ;;  %v1646_v11 = vmul.f32 %v3612_v6, %v1601_v57  ;;  %vm1652_vm1 = vweird.f32 %v3612_v6  ;;  %v3513_v2 = vld [vmem:[%s4856_s10 + $0x60] sm:$0xff] }
 0x46b   : > { %3613 = vrsqrt.f32 %v1602_v38  ;;  %vm1653_vm4 = vmor %vm1651_vm2, %vm1652_vm1  ;;  %vm1661_vm6 = vweird.f32 %v1602_v38  ;;  %2347 = vmatpush.bf16.msrb.mxu1 %v3506_v25 }
 0x46c   : > { %v1644_v9 = vsel %vm1643_vm0, %v3610_v41, %v1640_v8  ;;  %v1647_v60 = vmul.f32 %v3612_v6, %v1646_v11  ;;  %v3529_v41 = vld [vmem:[%s4856_s10 + $0xe0] sm:$0xff]  ;;  %2377 = vmatpush.bf16.msra.mxu2 %v3513_v2  ;;  %v3527_v8 = vld [vmem:[%s4856_s10 + $0xd0] sm:$0xff]  ;;  %v3512_v11 = vld [vmem:[%s4856_s10 + $0x58] sm:$0xff] }
 0x46d   : > { %v1688_v12 = vmul.f32 %v1644_v9, %v4124_v55  ;;  %2435 = vmatpush.bf16.msrb.mxu0 %v3529_v41  ;;  %v3520_v9 = vld [vmem:[%s4856_s10 + $0x98] sm:$0xff] }
 0x46e   : > { %v1648_v23 = vmul.f32 0.5, %v1647_v60 }
 0x46f   : > { %v1699_v15 = vmul.f32 %v4349_v33, %v1688_v12  ;;  %2348 = vmatpush.bf16.msrb.mxu1 %v3505_v42  ;;  %v3502_v12 = vld [vmem:[%s4856_s10 + $0x8] sm:$0xff] }
 0x470   : > { %v1649_v16 = vsub.f32 1.5, %v1648_v23  ;;  %2378 = vmatpush.bf16.msra.mxu2 %v3512_v11 }
 0x471   : > { %v3614_v17 = vpop.eup %3613  ;;  %v4377_v7 = vadd.f32 %v4356_v50, %v1699_v15  ;;  %2436 = vmatpush.bf16.msrb.mxu0 %v3528_v1  ;;  %v3511_v15 = vld [vmem:[%s4856_s10 + $0x50] sm:$0xff] }
 0x472   : > { %v1650_v52 = vmul.f32 %v3612_v6, %v1649_v16  ;;  %v1656_v59 = vmul.f32 %v3614_v17, %v1602_v38  ;;  %vm1662_vm5 = vweird.f32 %v3614_v17  ;;  %v3503_v38 = vld [vmem:[%s4856_s10 + $0x10] sm:$0xff] }
 0x473   : > { %v1716_v53 = vpack.c.bf16 %v4377_v7, %v4374_v18  ;;  %vm1663_vm7 = vmor %vm1661_vm6, %vm1662_vm5  ;;  %2349 = vmatpush.bf16.msrb.mxu1 %v3504_v54  ;;  %v3519_v16 = vld [vmem:[%s4856_s10 + $0x90] sm:$0xff] }
 0x474   : > { %v1657_v55 = vmul.f32 %v3614_v17, %v1656_v59  ;;  %v1654_v28 = vsel %vm1653_vm4, %v3612_v6, %v1650_v52  ;;  %v3521_v6 = vld [vmem:[%s4856_s10 + $0xa0] sm:$0xff]  ;;  %2379 = vmatpush.bf16.msra.mxu2 %v3511_v15 }
 0x475   : > { %1934 = vmatmul.bf16.gmra.mxu1 %v1716_v53  ;;  %1963 = vmatmul.bf16.gmra.mxu2 %v1716_v53  ;;  %v1689_v40 = vmul.f32 %v1654_v28, %v4129_v13  ;;  %v1586_v13 = vpop.xlane.xlu0 %1585  ;;  %v3501_v59 = vld [vmem:[%s4856_s10] sm:$0xff]  ;;  %v3510_v28 = vld [vmem:[%s4856_s10 + $0x48] sm:$0xff] }
 0x476   : > { %v1658_v21 = vmul.f32 0.5, %v1657_v55  ;;  %1992 = vmatmul.bf16.gmra.mxu3 %v1716_v53  ;;  %2021 = vmatmul.bf16.gmra.mxu0 %v1716_v53  ;;  %v3525_v53 = vld [vmem:[%s4856_s10 + $0xc0] sm:$0xff] }
 0x477   : > { %v1700_v24 = vmul.f32 %v4349_v33, %v1689_v40  ;;  %2406 = vmatpush.bf16.msrb.mxu3 %v3521_v6  ;;  %2350 = vmatpush.bf16.msrb.mxu1 %v3503_v38 }
 0x478   : > { %v1659_v62 = vsub.f32 1.5, %v1658_v21  ;;  %2437 = vmatpush.bf16.msrb.mxu0 %v3527_v8  ;;  %v3518_v21 = vld [vmem:[%s4856_s10 + $0x88] sm:$0xff]  ;;  %2380 = vmatpush.bf16.msra.mxu2 %v3510_v28 }
 0x479   : > { %v4386_v3 = vadd.f32 %v4356_v50, %v1700_v24  ;;  %v3517_v24 = vld [vmem:[%s4856_s10 + $0x80] sm:$0xff] }
 0x47a   : > { %v1660_v51 = vmul.f32 %v3614_v17, %v1659_v62 }
 0x47b   : > { %2407 = vmatpush.bf16.msrb.mxu3 %v3520_v9  ;;  %2351 = vmatpush.bf16.msrb.mxu1 %v3502_v12 }
 0x47c   : > { %v1664_v5 = vsel %vm1663_vm7, %v3614_v17, %v1660_v51  ;;  %2438 = vmatpush.bf16.msrb.mxu0 %v3526_v44 }
 0x47d   : > { %v1690_v22 = vmul.f32 %v1664_v5, %v4134_v47  ;;  %v1595_v47 = vmul.f32 %v1586_v13, %v4102_v49 }
 0x47f   : > { %v1701_v26 = vmul.f32 %v4349_v33, %v1690_v22  ;;  %v4394_v30 = vadd.f32 1e-05, %v1595_v47  ;;  %2408 = vmatpush.bf16.msrb.mxu3 %v3519_v16  ;;  %2352 = vmatpush.bf16.msrb.mxu1 %v3501_v59  ;;  %v3509_v22 = vld [vmem:[%s4856_s10 + $0x40] sm:$0xff] }
 0x480   : > { %2439 = vmatpush.bf16.msrb.mxu0 %v3525_v53  ;;  %2381 = vmatpush.bf16.msra.mxu2 %v3509_v22 }
 0x481   : > { %v4389_v27 = vadd.f32 %v4356_v50, %v1701_v26  ;;  %3615 = vrsqrt.f32 %v4394_v30  ;;  %vm1671_vm9 = vweird.f32 %v4394_v30 }
 0x483   : > { %v1717_v29 = vpack.c.bf16 %v4389_v27, %v4386_v3  ;;  %2409 = vmatpush.bf16.msrb.mxu3 %v3518_v21 }
 0x485   : > { %1939 = vmatmul.bf16.gmra.mxu1 %v1717_v29  ;;  %1968 = vmatmul.bf16.gmra.mxu2 %v1717_v29 }
 0x486   : > { %1997 = vmatmul.bf16.gmra.mxu3 %v1717_v29  ;;  %2026 = vmatmul.bf16.gmra.mxu0 %v1717_v29 }
 0x487   : > { %v4421_v37 = vpop.eup %3615  ;;  %2410 = vmatpush.bf16.msrb.mxu3 %v3517_v24 }
 0x488   : > { %v1666_v57 = vmul.f32 %v4421_v37, %v4394_v30  ;;  %vm1672_vm8 = vweird.f32 %v4421_v37 }
 0x489   : > { %vm1673_vm10 = vmor %vm1671_vm9, %vm1672_vm8 }
 0x48a   : > { %v1667_v61 = vmul.f32 %v4421_v37, %v1666_v57 }
 0x48c   : > { %v1668_v32 = vmul.f32 0.5, %v1667_v61 }
 0x48e   : > { %v1669_v60 = vsub.f32 1.5, %v1668_v32 }
 0x490   : > { %v1670_v17 = vmul.f32 %v4421_v37, %v1669_v60 }
 0x492   : > { %v1674_v62 = vsel %vm1673_vm10, %v4421_v37, %v1670_v17 }
 0x493   : > { %v1691_v5 = vmul.f32 %v1674_v62, %v4139_v20 }
 0x495   : > { %v1702_v47 = vmul.f32 %v4349_v33, %v1691_v5 }
 0x497   : > { %v4508_v30 = vadd.f32 %v4356_v50, %v1702_v47 }
 0x4c0   : > { %v1588_v63 = vpop.xlane.xlu1 %1587 }
 0x4c1   : > { %v1596_v0 = vmul.f32 %v1588_v63, %v4102_v49 }
 0x4c3   : > { %v1604_v58 = vadd.f32 1e-05, %v1596_v0 }
 0x4c5   : > { %3617 = vrsqrt.f32 %v1604_v58  ;;  %vm1681_vm12 = vweird.f32 %v1604_v58 }
 0x4cb   : > { %v3618_v23 = vpop.eup %3617 }
 0x4cc   : > { %v1676_v52 = vmul.f32 %v3618_v23, %v1604_v58  ;;  %vm1682_vm11 = vweird.f32 %v3618_v23 }
 0x4cd   : > { %vm1683_vm13 = vmor %vm1681_vm12, %vm1682_vm11 }
 0x4ce   : > { %v1677_v55 = vmul.f32 %v3618_v23, %v1676_v52 }
 0x4d0   : > { %v1678_v40 = vmul.f32 0.5, %v1677_v55 }
 0x4d2   : > { %v1679_v51 = vsub.f32 1.5, %v1678_v40 }
 0x4d4   : > { %v1680_v26 = vmul.f32 %v3618_v23, %v1679_v51 }
 0x4d6   : > { %v1684_v29 = vsel %vm1683_vm13, %v3618_v23, %v1680_v26 }
 0x4d7   : > { %v1692_v13 = vmul.f32 %v1684_v29, %v4339_v14  ;;  %v1751_v14 = vld [vmem:[%s4855_s9] sm:$0xf] }
 0x4d8   : > { %v4520_v46 = vperm.slane %v1751_v14, 3  ;;  %v4524_v39 = vperm.slane %v1751_v14, 1  ;;  %v4527_v41 = vperm.slane %v1751_v14, 2 }
 0x4d9   : > { %v1703_v20 = vmul.f32 %v4349_v33, %v1692_v13  ;;  %v4518_v33 = vperm.slane %v1751_v14, 0 }
 0x4db   : > { %v4511_v10 = vadd.f32 %v4356_v50, %v1703_v20 }
 0x4dd   : > { %v1718_v19 = vpack.c.bf16 %v4511_v10, %v4508_v30 }
 0x4df   : > { %1944 = vmatmul.bf16.gmra.mxu1 %v1718_v19  ;;  %1973 = vmatmul.bf16.gmra.mxu2 %v1718_v19 }
 0x4e0   : > { %2002 = vmatmul.bf16.gmra.mxu3 %v1718_v19  ;;  %2031 = vmatmul.bf16.gmra.mxu0 %v1718_v19 }
 0x4e2   : > { %v1930_v35 = vpop.f32.mrf.mxu1 }
 0x4e3   : > { %v2017_v34 = vpop.f32.mrf.mxu0  ;;  %v1931_v50 = vadd.f32 %v1930_v35, %v4518_v33 }
 0x4e4   : > { %v2018_v48 = vadd.f32 %v2017_v34, %v4520_v46 }
 0x4e5   : > { %v2037_v31 = vmax.f32 %v1931_v50, 0.0 }
 0x4e6   : > { %v2040_v61 = vmax.f32 %v2018_v48, 0.0 }
 0x4e8   : > { %v1959_v36 = vpop.f32.mrf.mxu2 }
 0x4e9   : > { %v1988_v25 = vpop.f32.mrf.mxu3  ;;  %v1960_v0 = vadd.f32 %v1959_v36, %v4524_v39 }
 0x4ea   : > { %v1932_v37 = vpop.f32.mrf.mxu1  ;;  %v1989_v1 = vadd.f32 %v1988_v25, %v4527_v41 }
 0x4eb   : > { %v1933_v56 = vadd.f32 %v1932_v37, %v4518_v33  ;;  %v2019_v42 = vpop.f32.mrf.mxu0  ;;  %v2038_v11 = vmax.f32 %v1960_v0, 0.0 }
 0x4ec   : > { %v2020_v57 = vadd.f32 %v2019_v42, %v4520_v46  ;;  %v2039_v12 = vmax.f32 %v1989_v1, 0.0 }
 0x4ed   : > { %v2041_v45 = vmax.f32 %v1933_v56, 0.0 }
 0x4ee   : > { %v2044_v63 = vmax.f32 %v2020_v57, 0.0 }
 0x4ef   : > { %v2069_v54 = vpack.c.bf16 %v2041_v45, %v2037_v31 }
 0x4f0   : > { %v2072_v58 = vpack.c.bf16 %v2044_v63, %v2040_v61  ;;  %v1961_v2 = vpop.f32.mrf.mxu2 }
 0x4f1   : > { %v1962_v6 = vadd.f32 %v1961_v2, %v4524_v39  ;;  %v1990_v32 = vpop.f32.mrf.mxu3  ;;  %2353 = vmatmul.bf16.vlgmr.msrb.gmra.mxu1 %v2069_v54 }
 0x4f2   : > { %v1991_v38 = vadd.f32 %v1990_v32, %v4527_v41  ;;  %2440 = vmatmul.bf16.vlgmr.msrb.gmra.mxu0 %v2072_v58  ;;  %v1935_v8 = vpop.f32.mrf.mxu1 }
 0x4f3   : > { %v2042_v9 = vmax.f32 %v1962_v6, 0.0  ;;  %v2022_v60 = vpop.f32.mrf.mxu0  ;;  %v1936_v17 = vadd.f32 %v1935_v8, %v4518_v33 }
 0x4f4   : > { %v2043_v44 = vmax.f32 %v1991_v38, 0.0  ;;  %v2023_v59 = vadd.f32 %v2022_v60, %v4520_v46 }
 0x4f5   : > { %v2070_v23 = vpack.c.bf16 %v2042_v9, %v2038_v11  ;;  %v2045_v62 = vmax.f32 %v1936_v17, 0.0 }
 0x4f6   : > { %v2071_v15 = vpack.c.bf16 %v2043_v44, %v2039_v12  ;;  %v2048_v51 = vmax.f32 %v2023_v59, 0.0 }
 0x4f7   : > { %2382 = vmatmul.bf16.vlgmr.msra.gmra.mxu2 %v2070_v23 }
 0x4f8   : > { %2411 = vmatmul.bf16.vlgmr.msrb.gmra.mxu3 %v2071_v15  ;;  %v1964_v16 = vpop.f32.mrf.mxu2 }
 0x4f9   : > { %v1993_v52 = vpop.f32.mrf.mxu3  ;;  %v1965_v22 = vadd.f32 %v1964_v16, %v4524_v39 }
 0x4fa   : > { %v1937_v53 = vpop.f32.mrf.mxu1  ;;  %v1994_v26 = vadd.f32 %v1993_v52, %v4527_v41 }
 0x4fb   : > { %v1938_v55 = vadd.f32 %v1937_v53, %v4518_v33  ;;  %v2024_v28 = vpop.f32.mrf.mxu0  ;;  %v2046_v35 = vmax.f32 %v1965_v22, 0.0 }
 0x4fc   : > { %v2025_v21 = vadd.f32 %v2024_v28, %v4520_v46  ;;  %v2047_v50 = vmax.f32 %v1994_v26, 0.0 }
 0x4fd   : > { %v2049_v40 = vmax.f32 %v1938_v55, 0.0 }
 0x4fe   : > { %v2052_v5 = vmax.f32 %v2025_v21, 0.0 }
 0x4ff   : > { %v2073_v24 = vpack.c.bf16 %v2049_v40, %v2045_v62 }
 0x500   : > { %v1966_v29 = vpop.f32.mrf.mxu2  ;;  %v2076_v13 = vpack.c.bf16 %v2052_v5, %v2048_v51 }
 0x501   : > { %v1967_v47 = vadd.f32 %v1966_v29, %v4524_v39  ;;  %v1995_v20 = vpop.f32.mrf.mxu3  ;;  %2358 = vmatmul.bf16.gmra.mxu1 %v2073_v24 }
 0x502   : > { %v1996_v19 = vadd.f32 %v1995_v20, %v4527_v41  ;;  %2445 = vmatmul.bf16.gmra.mxu0 %v2076_v13  ;;  %v1940_v14 = vpop.f32.mrf.mxu1 }
 0x503   : > { %v2050_v34 = vmax.f32 %v1967_v47, 0.0  ;;  %v2027_v36 = vpop.f32.mrf.mxu0  ;;  %v1941_v42 = vadd.f32 %v1940_v14, %v4518_v33 }
 0x504   : > { %v2051_v25 = vmax.f32 %v1996_v19, 0.0  ;;  %v2028_v31 = vadd.f32 %v2027_v36, %v4520_v46 }
 0x505   : > { %v2074_v48 = vpack.c.bf16 %v2050_v34, %v2046_v35  ;;  %v2053_v54 = vmax.f32 %v1941_v42, 0.0 }
 0x506   : > { %v2075_v37 = vpack.c.bf16 %v2051_v25, %v2047_v50  ;;  %v2056_v58 = vmax.f32 %v2028_v31, 0.0  ;;  %v4561_v31 = vld [vmem:[%s4857_s11] ss:$0 sm:$0xff] }
 0x507   : > { %2387 = vmatmul.bf16.gmra.mxu2 %v2074_v48 }
 0x508   : > { %2416 = vmatmul.bf16.gmra.mxu3 %v2075_v37  ;;  %v1969_v56 = vpop.f32.mrf.mxu2 }
 0x509   : > { %v1998_v57 = vpop.f32.mrf.mxu3  ;;  %v1970_v6 = vadd.f32 %v1969_v56, %v4524_v39 }
 0x50a   : > { %v1942_v45 = vpop.f32.mrf.mxu1  ;;  %v1999_v38 = vadd.f32 %v1998_v57, %v4527_v41 }
 0x50b   : > { %v1943_v61 = vadd.f32 %v1942_v45, %v4518_v33  ;;  %v2029_v63 = vpop.f32.mrf.mxu0  ;;  %v2054_v44 = vmax.f32 %v1970_v6, 0.0 }
 0x50c   : > { %v2030_v0 = vadd.f32 %v2029_v63, %v4520_v46  ;;  %v2055_v15 = vmax.f32 %v1999_v38, 0.0 }
 0x50d   : > { %v2057_v1 = vmax.f32 %v1943_v61, 0.0 }
 0x50e   : > { %v2060_v2 = vmax.f32 %v2030_v0, 0.0 }
 0x50f   : > { %v2077_v32 = vpack.c.bf16 %v2057_v1, %v2053_v54 }
 0x510   : > { %v2080_v8 = vpack.c.bf16 %v2060_v2, %v2056_v58  ;;  %v1971_v11 = vpop.f32.mrf.mxu2 }
 0x511   : > { %v1972_v9 = vadd.f32 %v1971_v11, %v4524_v39  ;;  %v2000_v60 = vpop.f32.mrf.mxu3  ;;  %2363 = vmatmul.bf16.gmra.mxu1 %v2077_v32 }
 0x512   : > { %v2001_v12 = vadd.f32 %v2000_v60, %v4527_v41  ;;  %2450 = vmatmul.bf16.gmra.mxu0 %v2080_v8 }
 0x513   : > { %v2058_v23 = vmax.f32 %v1972_v9, 0.0 }
 0x514   : > { %v2059_v16 = vmax.f32 %v2001_v12, 0.0 }
 0x515   : > { %v2078_v17 = vpack.c.bf16 %v2058_v23, %v2054_v44 }
 0x516   : > { %v2079_v52 = vpack.c.bf16 %v2059_v16, %v2055_v15 }
 0x517   : > { %2392 = vmatmul.bf16.gmra.mxu2 %v2078_v17 }
 0x518   : > { %2421 = vmatmul.bf16.gmra.mxu3 %v2079_v52 }
 0x55c   : > { %v1945_v59 = vpop.f32.mrf.mxu1 }
 0x55d   : > { %v2032_v53 = vpop.f32.mrf.mxu0  ;;  %v1946_v28 = vadd.f32 %v1945_v59, %v4518_v33 }
 0x55e   : > { %v2033_v62 = vadd.f32 %v2032_v53, %v4520_v46 }
 0x55f   : > { %v2061_v24 = vmax.f32 %v1946_v28, 0.0 }
 0x560   : > { %v2064_v29 = vmax.f32 %v2033_v62, 0.0 }
 0x562   : > { %v1974_v55 = vpop.f32.mrf.mxu2 }
 0x563   : > { %v2003_v21 = vpop.f32.mrf.mxu3  ;;  %v1975_v47 = vadd.f32 %v1974_v55, %v4524_v39 }
 0x564   : > { %v1947_v40 = vpop.f32.mrf.mxu1  ;;  %v2004_v19 = vadd.f32 %v2003_v21, %v4527_v41 }
 0x565   : > { %v1948_v51 = vadd.f32 %v1947_v40, %v4518_v33  ;;  %v2034_v5 = vpop.f32.mrf.mxu0  ;;  %v2062_v50 = vmax.f32 %v1975_v47, 0.0 }
 0x566   : > { %v2035_v22 = vadd.f32 %v2034_v5, %v4520_v46  ;;  %v2063_v25 = vmax.f32 %v2004_v19, 0.0 }
 0x567   : > { %v2065_v26 = vmax.f32 %v1948_v51, 0.0 }
 0x568   : > { %v2068_v13 = vmax.f32 %v2035_v22, 0.0 }
 0x569   : > { %v2081_v20 = vpack.c.bf16 %v2065_v26, %v2061_v24 }
 0x56a   : > { %v2084_v14 = vpack.c.bf16 %v2068_v13, %v2064_v29  ;;  %v1976_v35 = vpop.f32.mrf.mxu2 }
 0x56b   : > { %v1977_v34 = vadd.f32 %v1976_v35, %v4524_v39  ;;  %v2005_v36 = vpop.f32.mrf.mxu3  ;;  %2368 = vmatmul.bf16.gmra.mxu1 %v2081_v20 }
 0x56c   : > { %v2006_v33 = vadd.f32 %v2005_v36, %v4527_v41  ;;  %2455 = vmatmul.bf16.gmra.mxu0 %v2084_v14 }
 0x56d   : > { %v2066_v46 = vmax.f32 %v1977_v34, 0.0 }
 0x56e   : > { %v2067_v48 = vmax.f32 %v2006_v33, 0.0  ;;  %v2354_v37 = vpop.f32.mrf.mxu1 }
 0x56f   : > { %v2082_v56 = vpack.c.bf16 %v2066_v46, %v2062_v50  ;;  %v2441_v57 = vpop.f32.mrf.mxu0  ;;  %v2355_v45 = vadd.f32 %v4561_v31, %v2354_v37  ;;  %v4588_v37 = vld [vmem:[%s3900_s20] sm:$0xff]  ;;  %s538_s20 = scalar_lea.vmem %s4862_s16, %s3009_s0 }
 0x570   : > { %v2083_v42 = vpack.c.bf16 %v2067_v48, %v2063_v25 }
 0x571   : > { %2397 = vmatmul.bf16.gmra.mxu2 %v2082_v56  ;;  %v2664_v56 = vperm.slane %v4588_v37, 1 }
 0x572   : > { %2426 = vmatmul.bf16.gmra.mxu3 %v2083_v42 }
 0x576   : > { %v2356_v39 = vpop.f32.mrf.mxu1 }
 0x577   : > { %v2443_v54 = vpop.f32.mrf.mxu0  ;;  %v2357_v2 = vadd.f32 %v4561_v31, %v2356_v39 }
 0x57a   : > { %v2383_v41 = vpop.f32.mrf.mxu2 }
 0x57b   : > { %v2384_v61 = vadd.f32 %v2383_v41, %v2355_v45  ;;  %v2412_v63 = vpop.f32.mrf.mxu3 }
 0x57d   : > { %v2413_v0 = vadd.f32 %v2412_v63, %v2384_v61 }
 0x57e   : > { %v2359_v58 = vpop.f32.mrf.mxu1 }
 0x57f   : > { %v2442_v1 = vadd.f32 %v2441_v57, %v2413_v0  ;;  %v2446_v60 = vpop.f32.mrf.mxu0  ;;  %v2360_v12 = vadd.f32 %v4561_v31, %v2359_v58 }
 0x581   : > { %v4566_v6 = vadd.f32 %v2442_v1, %v4361_v43  ;;  %v2658_v43 = vlaneseq }
 0x582   : > { %v2385_v32 = vpop.f32.mrf.mxu2 }
 0x583   : > { %v2386_v38 = vadd.f32 %v2385_v32, %v2357_v2  ;;  %v2414_v8 = vpop.f32.mrf.mxu3  ;;  %2471 = vadd.xlane.f32.xlu1 %v4566_v6  ;;  %v2659_v59 = vshrl.u32 %v2658_v43, 7 }
 0x585   : > { %v2415_v11 = vadd.f32 %v2414_v8, %v2386_v38  ;;  %3559 = vset.pattern.permute.xlu1 %v2659_v59  ;;  %3560 = vset.pattern.permute.xlu2 %v2659_v59 }
 0x586   : > { %v2361_v23 = vpop.f32.mrf.mxu1  ;;  %3561 = vset.pattern.permute.xlu0 %v2659_v59 }
 0x587   : > { %v2444_v9 = vadd.f32 %v2443_v54, %v2415_v11  ;;  %v2362_v55 = vadd.f32 %v4561_v31, %v2361_v23  ;;  %v2653_v23 = vsel %vm1030_vm3, %v4588_v37, 0.0 }
 0x589   : > { %v4571_v44 = vadd.f32 %v2444_v9, %v4364_v4  ;;  %v2448_v4 = vpop.f32.mrf.mxu0 }
 0x58a   : > { %v2388_v15 = vpop.f32.mrf.mxu2 }
 0x58b   : > { %v2389_v16 = vadd.f32 %v2388_v15, %v2360_v12  ;;  %v2417_v17 = vpop.f32.mrf.mxu3  ;;  %2473 = vadd.xlane.f32.xlu2 %v4571_v44 }
 0x58d   : > { %v2418_v52 = vadd.f32 %v2417_v17, %v2389_v16 }
 0x58e   : > { %v2364_v51 = vpop.f32.mrf.mxu1 }
 0x58f   : > { %v2447_v53 = vadd.f32 %v2446_v60, %v2418_v52  ;;  %v2365_v24 = vadd.f32 %v4561_v31, %v2364_v51  ;;  %v2671_v52 = vperm.slane %v4588_v37, 2  ;;  %v2657_v51 = vperm.slane %v4588_v37, 0 }
 0x591   : > { %v4576_v28 = vadd.f32 %v2447_v53, %v4374_v18  ;;  %v2451_v18 = vpop.f32.mrf.mxu0 }
 0x592   : > { %v2390_v21 = vpop.f32.mrf.mxu2 }
 0x593   : > { %v2391_v62 = vadd.f32 %v2390_v21, %v2362_v55  ;;  %v2419_v40 = vpop.f32.mrf.mxu3  ;;  %2475 = vadd.xlane.f32.xlu0 %v4576_v28  ;;  %v2685_v21 = vperm.slane %v4588_v37, 4 }
 0x595   : > { %v2420_v5 = vadd.f32 %v2419_v40, %v2391_v62 }
 0x596   : > { %v2366_v19 = vpop.f32.mrf.mxu1 }
 0x597   : > { %v2449_v22 = vadd.f32 %v2448_v4, %v2420_v5  ;;  %v2367_v35 = vadd.f32 %v4561_v31, %v2366_v19 }
 0x599   : > { %v2464_v26 = vadd.f32 %v2449_v22, %v4377_v7  ;;  %v2453_v46 = vpop.f32.mrf.mxu0 }
 0x59a   : > { %v2393_v29 = vpop.f32.mrf.mxu2 }
 0x59b   : > { %v2394_v13 = vadd.f32 %v2393_v29, %v2365_v24  ;;  %v2422_v47 = vpop.f32.mrf.mxu3  ;;  %2477 = vadd.xlane.f32.xlu2 %v2464_v26 }
 0x59d   : > { %v2423_v20 = vadd.f32 %v2422_v47, %v2394_v13  ;;  %v2678_v47 = vperm.slane %v4588_v37, 3 }
 0x59f   : > { %v2452_v14 = vadd.f32 %v2451_v18, %v2423_v20 }
 0x5a1   : > { %v4583_v34 = vadd.f32 %v2452_v14, %v4386_v3 }
 0x5a2   : > { %v2395_v36 = vpop.f32.mrf.mxu2 }
 0x5a3   : > { %v2396_v33 = vadd.f32 %v2395_v36, %v2367_v35  ;;  %2479 = vadd.xlane.f32.xlu0 %v4583_v34  ;;  %v2424_v50 = vpop.f32.mrf.mxu3 }
 0x5a5   : > { %v2425_v7 = vadd.f32 %v2424_v50, %v2396_v33  ;;  %v2699_v33 = vperm.slane %v4588_v37, 6 }
 0x5a7   : > { %v2454_v25 = vadd.f32 %v2453_v46, %v2425_v7  ;;  %v2706_v7 = vperm.slane %v4588_v37, 7 }
 0x5a9   : > { %v2466_v48 = vadd.f32 %v2454_v25, %v4389_v27 }
 0x5ab   : > { %2481 = vadd.xlane.f32.xlu1 %v2466_v48 }
 0x5c4   : > { %2669 = vperm.xlu1 %3559, %v2664_v56  }
 0x5e8   : > { %v2369_v42 = vpop.f32.mrf.mxu1 }
 0x5e9   : > { %v2370_v3 = vadd.f32 %v4561_v31, %v2369_v42  ;;  %v2456_v41 = vpop.f32.mrf.mxu0 }
 0x5f0   : > { %v2371_v63 = vpop.f32.mrf.mxu1 }
 0x5f1   : > { %v2372_v54 = vadd.f32 %v4561_v31, %v2371_v63  ;;  %v2458_v11 = vpop.f32.mrf.mxu0 }
 0x5f4   : > { %v2398_v57 = vpop.f32.mrf.mxu2 }
 0x5f5   : > { %v2399_v39 = vadd.f32 %v2398_v57, %v2370_v3  ;;  %v2427_v45 = vpop.f32.mrf.mxu3 }
 0x5f7   : > { %v2428_v61 = vadd.f32 %v2427_v45, %v2399_v39 }
 0x5f9   : > { %v2457_v0 = vadd.f32 %v2456_v41, %v2428_v61 }
 0x5fb   : > { %v2467_v27 = vadd.f32 %v2457_v0, %v4508_v30  ;;  %v2472_v30 = vpop.xlane.xlu1 %2471 }
 0x5fc   : > { %v2400_v1 = vpop.f32.mrf.mxu2  ;;  %v2487_v15 = vmul.f32 %v2472_v30, %v4102_v49 }
 0x5fd   : > { %v2401_v58 = vadd.f32 %v2400_v1, %v2372_v54  ;;  %2483 = vadd.xlane.f32.xlu2 %v2467_v27  ;;  %v2429_v2 = vpop.f32.mrf.mxu3 }
 0x5fe   : > { %v2474_v32 = vpop.xlane.xlu2 %2473 }
 0x5ff   : > { %v2430_v38 = vadd.f32 %v2429_v2, %v2401_v58  ;;  %v2488_v8 = vmul.f32 %v2474_v32, %v4102_v49 }
 0x601   : > { %v2459_v9 = vadd.f32 %v2458_v11, %v2430_v38  ;;  %v4596_v60 = vsub.f32 %v4571_v44, %v2488_v8  ;;  %v4606_v44 = vsub.f32 %v4566_v6, %v2487_v15 }
 0x603   : > { %v2504_v12 = vmul.f32 %v4596_v60, %v4596_v60  ;;  %v2468_v31 = vadd.f32 %v2459_v9, %v4511_v10  ;;  %v2503_v59 = vmul.f32 %v4606_v44, %v4606_v44 }
 0x605   : > { %2513 = vadd.xlane.f32.xlu1 %v2504_v12  ;;  %2485 = vadd.xlane.f32.xlu0 %v2468_v31 }
 0x606   : > { %v2476_v62 = vpop.xlane.xlu0 %2475 }
 0x607   : > { %v2489_v40 = vmul.f32 %v2476_v62, %v4102_v49 }
 0x609   : > { %v4624_v5 = vsub.f32 %v4576_v28, %v2489_v40  ;;  %v2692_v28 = vperm.slane %v4588_v37, 5 }
 0x60d   : > { %2654 = vadd.xlane.f32.xlu0 %v2653_v23  ;;  %v3540_v23 = vld [vmem:[%s4860_s14 + $0x38] sm:$0xff] }
 0x60e   : > { %v2478_v16 = vpop.xlane.xlu2 %2477  ;;  %2923 = vmatpush.bf16.msra.mxu1 %v3540_v23 }
 0x60f   : > { %v2490_v17 = vmul.f32 %v2478_v16, %v4102_v49 }
 0x611   : > { %v4608_v43 = vsub.f32 %v2464_v26, %v2490_v17  ;;  %v2505_v26 = vmul.f32 %v4624_v5, %v4624_v5 }
 0x613   : > { %v2506_v10 = vmul.f32 %v4608_v43, %v4608_v43 }
 0x615   : > { %2676 = vperm.xlu2 %3560, %v2671_v52   ;;  %2517 = vadd.xlane.f32.xlu1 %v2506_v10 }
 0x616   : > { %2511 = vadd.xlane.f32.xlu0 %v2503_v59  ;;  %v2480_v22 = vpop.xlane.xlu0 %2479 }
 0x617   : > { %v2491_v24 = vmul.f32 %v2480_v22, %v4102_v49 }
 0x619   : > { %v4630_v29 = vsub.f32 %v4583_v34, %v2491_v24 }
 0x61b   : > { %v2507_v13 = vmul.f32 %v4630_v29, %v4630_v29 }
 0x61e   : > { %v2482_v53 = vpop.xlane.xlu1 %2481 }
 0x61f   : > { %v2492_v55 = vmul.f32 %v2482_v53, %v4102_v49 }
 0x621   : > { %v4616_v4 = vsub.f32 %v2466_v48, %v2492_v55 }
 0x623   : > { %v2508_v6 = vmul.f32 %v4616_v4, %v4616_v4 }
 0x625   : > { %2521 = vadd.xlane.f32.xlu0 %v2508_v6 }
 0x62e   : > { %2690 = vperm.xlu1 %3559, %v2685_v21  }
 0x636   : > { %v4650_v25 = vpop.permute.xlu1 %2669 }
 0x639   : > { %2662 = vperm.xlu0 %3561, %v2657_v51  }
 0x63e   : > { %2515 = vadd.xlane.f32.xlu2 %v2505_v26 }
 0x646   : > { %2519 = vadd.xlane.f32.xlu2 %v2507_v13 }
 0x65e   : > { %2683 = vperm.xlu2 %3560, %v2678_v47  }
 0x666   : > { %2697 = vperm.xlu2 %3560, %v2692_v28  }
 0x670   : > { %v2484_v18 = vpop.xlane.xlu2 %2483 }
 0x671   : > { %v2493_v20 = vmul.f32 %v2484_v18, %v4102_v49 }
 0x673   : > { %v4637_v19 = vsub.f32 %v2467_v27, %v2493_v20 }
 0x675   : > { %v2509_v14 = vmul.f32 %v4637_v19, %v4637_v19 }
 0x677   : > { %2523 = vadd.xlane.f32.xlu1 %v2509_v14 }
 0x678   : > { %v2486_v35 = vpop.xlane.xlu0 %2485  ;;  %v4648_v46 = vpop.permute.xlu2 %2676 }
 0x679   : > { %v2494_v34 = vmul.f32 %v2486_v35, %v4102_v49  ;;  %v2514_v42 = vpop.xlane.xlu1 %2513 }
 0x67a   : > { %v2528_v3 = vmul.f32 %v2514_v42, %v4102_v49 }
 0x67b   : > { %v4642_v36 = vsub.f32 %v2468_v31, %v2494_v34 }
 0x67c   : > { %v2536_v41 = vadd.f32 1e-05, %v2528_v3 }
 0x67d   : > { %v2510_v50 = vmul.f32 %v4642_v36, %v4642_v36 }
 0x67e   : > { %3619 = vrsqrt.f32 %v2536_v41  ;;  %vm2559_vm15 = vweird.f32 %v2536_v41 }
 0x680   : > { %v4652_v48 = vpop.xlane.xlu0 %2654 }
 0x684   : > { %v3620_v38 = vpop.eup %3619 }
 0x685   : > { %v2554_v11 = vmul.f32 %v3620_v38, %v2536_v41  ;;  %vm2560_vm3 = vweird.f32 %v3620_v38 }
 0x686   : > { %vm2561_vm0 = vmor %vm2559_vm15, %vm2560_vm3 }
 0x687   : > { %v2555_v15 = vmul.f32 %v3620_v38, %v2554_v11 }
 0x688   : > { %v2518_v61 = vpop.xlane.xlu1 %2517 }
 0x689   : > { %v2512_v39 = vpop.xlane.xlu0 %2511  ;;  %v2530_v54 = vmul.f32 %v2518_v61, %v4102_v49  ;;  %v2556_v53 = vmul.f32 0.5, %v2555_v15 }
 0x68a   : > { %v2527_v63 = vmul.f32 %v2512_v39, %v4102_v49 }
 0x68b   : > { %v4663_v2 = vadd.f32 1e-05, %v2530_v54  ;;  %v2557_v51 = vsub.f32 1.5, %v2556_v53 }
 0x68c   : > { %v4659_v27 = vadd.f32 1e-05, %v2527_v63  ;;  %v4716_v63 = vld [vmem:[%s4858_s12] ss:$0 sm:$0xff] }
 0x68d   : > { %v2558_v18 = vmul.f32 %v3620_v38, %v2557_v51  ;;  %vm2579_vm11 = vweird.f32 %v4663_v2 }
 0x68e   : > { %vm2549_vm6 = vweird.f32 %v4659_v27 }
 0x68f   : > { %2525 = vadd.xlane.f32.xlu2 %v2510_v50 }
 0x690   : > { %2704 = vperm.xlu1 %3559, %v2699_v33  }
 0x698   : > { %v2522_v1 = vpop.xlane.xlu0 %2521 }
 0x699   : > { %v2532_v32 = vmul.f32 %v2522_v1, %v4102_v49 }
 0x69b   : > { %v4669_v9 = vadd.f32 1e-05, %v2532_v32 }
 0x69d   : > { %vm2599_vm3 = vweird.f32 %v4669_v9 }
 0x6a0   : > { %v4685_v59 = vpop.permute.xlu1 %2690 }
 0x6a7   : > { %2711 = vperm.xlu2 %3560, %v2706_v7  }
 0x6ab   : > { %v2663_v51 = vpop.permute.xlu0 %2662 }
 0x6b1   : > { %v2516_v56 = vpop.xlane.xlu2 %2515 }
 0x6b2   : > { %v2529_v57 = vmul.f32 %v2516_v56, %v4102_v49  ;;  %v2562_v56 = vsel %vm2561_vm0, %v3620_v38, %v2558_v18 }
 0x6b4   : > { %v2537_v37 = vadd.f32 1e-05, %v2529_v57 }
 0x6b6   : > { %3621 = vrsqrt.f32 %v2537_v37  ;;  %vm2569_vm1 = vweird.f32 %v2537_v37 }
 0x6b7   : > { %3623 = vrsqrt.f32 %v4659_v27 }
 0x6b9   : > { %v2520_v45 = vpop.xlane.xlu2 %2519 }
 0x6ba   : > { %v2531_v0 = vmul.f32 %v2520_v45, %v4102_v49 }
 0x6bc   : > { %v4661_v58 = vadd.f32 1e-05, %v2531_v0  ;;  %v3622_v8 = vpop.eup %3621  ;;  %v4720_v0 = vmax.f32 %v4652_v48, 1.0  ;;  %v4733_v48 = vld [vmem:[%s4859_s13] ss:$0 sm:$0xff] }
 0x6bd   : > { %v2564_v12 = vmul.f32 %v3622_v8, %v2537_v37  ;;  %v4671_v31 = vpop.eup %3623  ;;  %vm2570_vm14 = vweird.f32 %v3622_v8  ;;  %v2624_v37 = vmul.f32 %v2562_v56, %v4596_v60 }
 0x6be   : > { %3625 = vrsqrt.f32 %v4661_v58  ;;  %v2544_v17 = vmul.f32 %v4671_v31, %v4659_v27  ;;  %vm4700_vm2 = vmor %vm2569_vm1, %vm2570_vm14  ;;  %vm2550_vm4 = vweird.f32 %v4671_v31  ;;  %vm2589_vm9 = vweird.f32 %v4661_v58 }
 0x6bf   : > { %3627 = vrsqrt.f32 %v4663_v2  ;;  %v2565_v52 = vmul.f32 %v3622_v8, %v2564_v12  ;;  %vm2551_vm8 = vmor %vm2549_vm6, %vm2550_vm4  ;;  %v2635_v27 = vmul.f32 %v4716_v63, %v2624_v37 }
 0x6c0   : > { %3629 = vrsqrt.f32 %v4669_v9  ;;  %v2545_v6 = vmul.f32 %v4671_v31, %v2544_v17 }
 0x6c1   : > { %v2566_v21 = vmul.f32 0.5, %v2565_v52  ;;  %v4709_v41 = vpop.permute.xlu2 %2683  ;;  %v2646_v23 = vadd.f32 %v4733_v48, %v2635_v27 }
 0x6c2   : > { %v2546_v24 = vmul.f32 0.5, %v2545_v6 }
 0x6c3   : > { %v2567_v13 = vsub.f32 1.5, %v2566_v21  ;;  %v2714_v6 = vmul.f32 %v4650_v25, %v2646_v23  ;;  %v3538_v25 = vld [vmem:[%s4860_s14 + $0x28] sm:$0xff] }
 0x6c4   : > { %v4673_v30 = vpop.eup %3625  ;;  %v2547_v35 = vsub.f32 1.5, %v2546_v24 }
 0x6c5   : > { %v4679_v16 = vpop.eup %3627  ;;  %v2584_v10 = vmul.f32 %v4673_v30, %v4661_v58  ;;  %v2568_v33 = vmul.f32 %v3622_v8, %v2567_v13  ;;  %vm2590_vm5 = vweird.f32 %v4673_v30  ;;  %v2727_v18 = vrot.slane %v2714_v6, 4 }
 0x6c6   : > { %v2574_v55 = vmul.f32 %v4679_v16, %v4663_v2  ;;  %v4690_v62 = vpop.eup %3629  ;;  %v2548_v57 = vmul.f32 %v4671_v31, %v2547_v35  ;;  %vm2580_vm7 = vweird.f32 %v4679_v16  ;;  %vm2591_vm10 = vmor %vm2589_vm9, %vm2590_vm5 }
 0x6c7   : > { %v2585_v40 = vmul.f32 %v4673_v30, %v2584_v10  ;;  %v2594_v26 = vmul.f32 %v4690_v62, %v4669_v9  ;;  %v2572_v45 = vsel %vm4700_vm2, %v3622_v8, %v2568_v33  ;;  %vm2581_vm12 = vmor %vm2579_vm11, %vm2580_vm7  ;;  %vm2600_vm13 = vweird.f32 %v4690_v62 }
 0x6c8   : > { %v2575_v22 = vmul.f32 %v4679_v16, %v2574_v55  ;;  %v2625_v1 = vmul.f32 %v2572_v45, %v4624_v5  ;;  %v2552_v38 = vsel %vm2551_vm8, %v4671_v31, %v2548_v57  ;;  %vm4747_vm14 = vmor %vm2599_vm3, %vm2600_vm13  ;;  %v2728_v57 = vadd.f32 %v2727_v18, %v2714_v6  ;;  %v3534_v6 = vld [vmem:[%s4860_s14 + $0x8] sm:$0xff] }
 0x6c9   : > { %v2586_v47 = vmul.f32 0.5, %v2585_v40  ;;  %v2595_v34 = vmul.f32 %v4690_v62, %v2594_v26  ;;  %v2623_v58 = vmul.f32 %v2552_v38, %v4606_v44  ;;  %v2698_v17 = vpop.permute.xlu2 %2697  ;;  %vm2774_vm2 = vweird.f32 %v4720_v0 }
 0x6ca   : > { %v2576_v20 = vmul.f32 0.5, %v2575_v22  ;;  %v2636_v11 = vmul.f32 %v4716_v63, %v2625_v1  ;;  %v2778_v38 = vand.u32 2147483647, %v4720_v0  ;;  %vm2856_vm11 = vcmask 1042434  }
 0x6cb   : > { %v2587_v50 = vsub.f32 1.5, %v2586_v47  ;;  %v2596_v39 = vmul.f32 0.5, %v2595_v34  ;;  %vm2862_vm13 = vcmask 1044484   ;;  %vm2865_vm3 = vcmask 1045509  }
 0x6cc   : > { %v2577_v42 = vsub.f32 1.5, %v2576_v20  ;;  %v2647_v10 = vadd.f32 %v4733_v48, %v2636_v11  ;;  %vm4805_vm6 = vcmp.eq.f32.partialorder %v2778_v38, 8.507059e+37 }
 0x6cd   : > { %v2588_v61 = vmul.f32 %v4673_v30, %v2587_v50  ;;  %v2597_v32 = vsub.f32 1.5, %v2596_v39 }
 0x6ce   : > { %v2578_v54 = vmul.f32 %v4679_v16, %v2577_v42  ;;  %v2715_v22 = vmul.f32 %v4648_v46, %v2647_v10 }
 0x6cf   : > { %v2592_v60 = vsel %vm2591_vm10, %v4673_v30, %v2588_v61  ;;  %v2598_v12 = vmul.f32 %v4690_v62, %v2597_v32  ;;  %vm2853_vm10 = vcmask 1041409  }
 0x6d0   : > { %v2582_v2 = vsel %vm2581_vm12, %v4679_v16, %v2578_v54  ;;  %v2627_v31 = vmul.f32 %v2592_v60, %v4630_v29  ;;  %v2634_v16 = vmul.f32 %v4716_v63, %v2623_v58  ;;  %v3539_v29 = vld [vmem:[%s4860_s14 + $0x30] sm:$0xff]  ;;  %v2780_v60 = vand.u32 2147483648, %v4720_v0 }
 0x6d1   : > { %v2626_v15 = vmul.f32 %v2582_v2, %v4608_v43  ;;  %v2602_v43 = vsel %vm4747_vm14, %v4690_v62, %v2598_v12  ;;  %2924 = vmatpush.bf16.msra.mxu1 %v3539_v29  ;;  %v3535_v12 = vld [vmem:[%s4860_s14 + $0x10] sm:$0xff]  ;;  %vm2859_vm12 = vcmask 1043459   ;;  %vm2868_vm14 = vcmask 1046534  }
 0x6d2   : > { %v2638_v53 = vmul.f32 %v4716_v63, %v2627_v31  ;;  %v2628_v24 = vmul.f32 %v2602_v43, %v4616_v4  ;;  %v2645_v26 = vadd.f32 %v4733_v48, %v2634_v16  ;;  %v2781_v44 = vor.u32 1.1754944e-38, %v2780_v60 }
 0x6d3   : > { %v2637_v21 = vmul.f32 %v4716_v63, %v2626_v15 }
 0x6d4   : > { %v2649_v13 = vadd.f32 %v4733_v48, %v2638_v53  ;;  %v2713_v20 = vmul.f32 %v2663_v51, %v2645_v26  ;;  %v2639_v35 = vmul.f32 %v4716_v63, %v2628_v24 }
 0x6d5   : > { %v2648_v46 = vadd.f32 %v4733_v48, %v2637_v21  ;;  %2925 = vmatpush.bf16.msra.mxu1 %v3538_v25 }
 0x6d6   : > { %v2721_v39 = vrot.slane %v2713_v20, 4  ;;  %v2650_v61 = vadd.f32 %v4733_v48, %v2639_v35 }
 0x6d7   : > { %v2716_v56 = vmul.f32 %v4709_v41, %v2648_v46  ;;  %v3536_v41 = vld [vmem:[%s4860_s14 + $0x18] sm:$0xff] }
 0x6d8   : > { %v2718_v32 = vmul.f32 %v2698_v17, %v2650_v61  ;;  %v2722_v27 = vadd.f32 %v2721_v39, %v2713_v20 }
 0x6d9   : > { %v2739_v1 = vrot.slane %v2716_v56, 4 }
 0x6da   : > { %v2751_v15 = vrot.slane %v2718_v32, 4  ;;  %v2723_v16 = vrot.slane %v2722_v27, 2 }
 0x6db   : > { %v2740_v23 = vadd.f32 %v2739_v1, %v2716_v56 }
 0x6dd   : > { %v2741_v21 = vrot.slane %v2740_v23, 2 }
 0x6ea   : > { %v2524_v28 = vpop.xlane.xlu1 %2523 }
 0x6eb   : > { %v2533_v14 = vmul.f32 %v2524_v28, %v4102_v49 }
 0x6ed   : > { %v4698_v7 = vadd.f32 1e-05, %v2533_v14  ;;  %v2733_v14 = vrot.slane %v2715_v22, 4 }
 0x6ef   : > { %3631 = vrsqrt.f32 %v4698_v7  ;;  %vm2609_vm0 = vweird.f32 %v4698_v7  ;;  %v2734_v45 = vadd.f32 %v2733_v14, %v2715_v22 }
 0x6f0   : > { %3633 = vrcp.f32 %v4720_v0 }
 0x6f5   : > { %v3632_v8 = vpop.eup %3631 }
 0x6f6   : > { %v2604_v5 = vmul.f32 %v3632_v8, %v4698_v7  ;;  %vm2610_vm15 = vweird.f32 %v3632_v8  ;;  %v4760_v55 = vpop.eup %3633  ;;  %v2717_v7 = vmul.f32 %v4685_v59, %v2649_v13 }
 0x6f7   : > { %vm2611_vm1 = vmor %vm2609_vm0, %vm2610_vm15  ;;  %v2770_v62 = vmul.f32 %v4760_v55, %v4720_v0  ;;  %vm2775_vm4 = vweird.f32 %v4760_v55  ;;  %vm2871_vm15 = vcmask 1047559  }
 0x6f8   : > { %v2605_v30 = vmul.f32 %v3632_v8, %v2604_v5  ;;  %v2745_v37 = vrot.slane %v2717_v7, 4  ;;  %v2735_v5 = vrot.slane %v2734_v45, 2  ;;  %vm4801_vm5 = vmor %vm2774_vm2, %vm2775_vm4 }
 0x6f9   : > { %v2771_v50 = vsub.f32 1.0, %v2770_v62  ;;  %v2724_v62 = vadd.f32 %v2723_v16, %v2722_v27 }
 0x6fa   : > { %v2606_v52 = vmul.f32 0.5, %v2605_v30  ;;  %v2746_v11 = vadd.f32 %v2745_v37, %v2717_v7  ;;  %v2736_v10 = vadd.f32 %v2735_v5, %v2734_v45 }
 0x6fb   : > { %v2772_v59 = vmul.f32 %v4760_v55, %v2771_v50  ;;  %v2725_v14 = vrot.slane %v2724_v62, 1 }
 0x6fc   : > { %v2607_v9 = vsub.f32 1.5, %v2606_v52  ;;  %v2747_v53 = vrot.slane %v2746_v11, 2  ;;  %v2737_v26 = vrot.slane %v2736_v10, 1 }
 0x6fd   : > { %v2773_v58 = vadd.f32 %v4760_v55, %v2772_v59  ;;  %v2726_v39 = vadd.f32 %v2725_v14, %v2724_v62 }
 0x6fe   : > { %v2608_v40 = vmul.f32 %v3632_v8, %v2607_v9  ;;  %v2748_v13 = vadd.f32 %v2747_v53, %v2746_v11 }
 0x6ff   : > { %v2777_v29 = vsel %vm4801_vm5, %v4760_v55, %v2773_v58  ;;  %v3533_v55 = vld [vmem:[%s4860_s14] sm:$0xff] }
 0x700   : > { %v2612_v47 = vsel %vm2611_vm1, %v3632_v8, %v2608_v40  ;;  %v2729_v8 = vrot.slane %v2728_v57, 2  ;;  %v2752_v40 = vadd.f32 %v2751_v15, %v2718_v32  ;;  %v4818_v24 = vsel %vm4805_vm6, %v2781_v44, %v2777_v29 }
 0x701   : > { %v2629_v28 = vmul.f32 %v2612_v47, %v4637_v19  ;;  %v3537_v19 = vld [vmem:[%s4860_s14 + $0x20] sm:$0xff]  ;;  %v2786_v35 = vrot.slane %v4818_v24, 2  ;;  %v2800_v38 = vmul.f32 %v4818_v24, %v2726_v39  ;;  %v2789_v11 = vrot.slane %v4818_v24, 5 }
 0x702   : > { %v2526_v4 = vpop.xlane.xlu2 %2525  ;;  %2926 = vmatpush.bf16.msra.mxu1 %v3537_v19  ;;  %v2730_v52 = vadd.f32 %v2729_v8, %v2728_v57  ;;  %v2753_v18 = vrot.slane %v2752_v40, 2  ;;  %v2791_v62 = vrot.slane %v4818_v24, 7 }
 0x703   : > { %v2640_v34 = vmul.f32 %v4716_v63, %v2629_v28  ;;  %v2534_v33 = vmul.f32 %v2526_v4, %v4102_v49  ;;  %v2705_v49 = vpop.permute.xlu1 %2704  ;;  %v2742_v28 = vadd.f32 %v2741_v21, %v2740_v23  ;;  %v2785_v4 = vrot.slane %v4818_v24, 1 }
 0x704   : > { %v2731_v22 = vrot.slane %v2730_v52, 1  ;;  %v2754_v56 = vadd.f32 %v2753_v18, %v2752_v40 }
 0x705   : > { %v2651_v42 = vadd.f32 %v4733_v48, %v2640_v34  ;;  %v4785_v3 = vadd.f32 1e-05, %v2534_v33  ;;  %v2738_v34 = vadd.f32 %v2737_v26, %v2736_v10  ;;  %v2749_v33 = vrot.slane %v2748_v13, 1 }
 0x706   : > { %2927 = vmatpush.bf16.msra.mxu1 %v3536_v41  ;;  %v2732_v46 = vadd.f32 %v2731_v22, %v2730_v52  ;;  %v2743_v19 = vrot.slane %v2742_v28, 1  ;;  %v2755_v41 = vrot.slane %v2754_v56, 1 }
 0x707   : > { %3635 = vrsqrt.f32 %v4785_v3  ;;  %v2719_v54 = vmul.f32 %v2705_v49, %v2651_v42  ;;  %vm2619_vm8 = vweird.f32 %v4785_v3  ;;  %v2750_v45 = vadd.f32 %v2749_v33, %v2748_v13 }
 0x708   : > { %v2801_v57 = vmul.f32 %v2785_v4, %v2732_v46  ;;  %v2802_v61 = vmul.f32 %v2786_v35, %v2738_v34  ;;  %v2788_v49 = vrot.slane %v4818_v24, 4  ;;  %v2744_v37 = vadd.f32 %v2743_v19, %v2742_v28  ;;  %v3568_v19 = vld [vmem:[%s4861_s15] ss:$0 sm:$0xff] }
 0x709   : > { %v2757_v2 = vrot.slane %v2719_v54, 4  ;;  %v2756_v58 = vadd.f32 %v2755_v41, %v2754_v56 }
 0x70a   : > { %2928 = vmatpush.bf16.msra.mxu1 %v3535_v12  ;;  %v2712_v32 = vpop.permute.xlu2 %2711  ;;  %v2810_v60 = vpack.c.bf16 %v2802_v61, %v2802_v61  ;;  %v2804_v27 = vmul.f32 %v2788_v49, %v2750_v45  ;;  %v2790_v12 = vrot.slane %v4818_v24, 6 }
 0x70b   : > { %v2758_v43 = vadd.f32 %v2757_v2, %v2719_v54  ;;  %v2787_v54 = vrot.slane %v4818_v24, 3  ;;  %v2805_v52 = vmul.f32 %v2789_v11, %v2756_v58 }
 0x70c   : > { %v2846_v15 = vunpack.c.l.b16 %v2810_v60 }
 0x70d   : > { %v3636_v31 = vpop.eup %3635  ;;  %v2759_v47 = vrot.slane %v2758_v43, 2  ;;  %v2813_v21 = vpack.c.bf16 %v2805_v52, %v2805_v52 }
 0x70e   : > { %v2614_v0 = vmul.f32 %v3636_v31, %v4785_v3  ;;  %2929 = vmatpush.bf16.msra.mxu1 %v3534_v6  ;;  %vm2620_vm7 = vweird.f32 %v3636_v31  ;;  %v2855_v53 = vrot.slane %v2846_v15, 6 }
 0x70f   : > { %vm2621_vm9 = vmor %vm2619_vm8, %vm2620_vm7  ;;  %v2760_v50 = vadd.f32 %v2759_v47, %v2758_v43 }
 0x710   : > { %v2615_v9 = vmul.f32 %v3636_v31, %v2614_v0 }
 0x711   : > { %v2761_v59 = vrot.slane %v2760_v50, 1 }
 0x712   : > { %v2616_v51 = vmul.f32 0.5, %v2615_v9  ;;  %2930 = vmatpush.bf16.msra.mxu1 %v3533_v55 }
 0x713   : > { %v2762_v5 = vadd.f32 %v2761_v59, %v2760_v50 }
 0x714   : > { %v2617_v25 = vsub.f32 1.5, %v2616_v51 }
 0x715   : > { %v2806_v17 = vmul.f32 %v2790_v12, %v2762_v5 }
 0x716   : > { %v2618_v20 = vmul.f32 %v3636_v31, %v2617_v25  ;;  %v2849_v25 = vunpack.c.l.b16 %v2813_v21 }
 0x717   : > { %v2814_v9 = vpack.c.bf16 %v2806_v17, %v2806_v17 }
 0x718   : > { %v2622_v7 = vsel %vm2621_vm9, %v3636_v31, %v2618_v20  ;;  %v2808_v31 = vpack.c.bf16 %v2800_v38, %v2800_v38  ;;  %v2864_v14 = vrot.slane %v2849_v25, 3 }
 0x719   : > { %v2630_v42 = vmul.f32 %v2622_v7, %v4642_v36  ;;  %v2809_v36 = vpack.c.bf16 %v2801_v57, %v2801_v57  ;;  %v2850_v13 = vunpack.c.l.b16 %v2814_v9 }
 0x71a   : > { %v2844_v16 = vunpack.c.l.b16 %v2808_v31 }
 0x71b   : > { %v2641_v3 = vmul.f32 %v4716_v63, %v2630_v42  ;;  %v2803_v63 = vmul.f32 %v2787_v54, %v2744_v37  ;;  %v2845_v23 = vunpack.c.l.b16 %v2809_v36  ;;  %v2867_v4 = vrot.slane %v2850_v13, 2 }
 0x71d   : > { %v2652_v1 = vadd.f32 %v4733_v48, %v2641_v3  ;;  %v2812_v48 = vpack.c.bf16 %v2804_v27, %v2804_v27  ;;  %v2811_v0 = vpack.c.bf16 %v2803_v63, %v2803_v63  ;;  %v2852_v29 = vrot.slane %v2845_v23, 7 }
 0x71f   : > { %v2720_v8 = vmul.f32 %v2712_v32, %v2652_v1  ;;  %v2848_v43 = vunpack.c.l.b16 %v2812_v48  ;;  %v2847_v6 = vunpack.c.l.b16 %v2811_v0  ;;  %v2854_v51 = vsel %vm2853_vm10, %v2852_v29, %v2844_v16 }
 0x720   : > { %v2857_v26 = vsel %vm2856_vm11, %v2855_v53, %v2854_v51 }
 0x721   : > { %v2763_v2 = vrot.slane %v2720_v8, 4  ;;  %v2861_v55 = vrot.slane %v2848_v43, 4  ;;  %v2858_v47 = vrot.slane %v2847_v6, 5 }
 0x723   : > { %v2764_v30 = vadd.f32 %v2763_v2, %v2720_v8  ;;  %v2860_v18 = vsel %vm2859_vm12, %v2858_v47, %v2857_v26 }
 0x724   : > { %v2863_v46 = vsel %vm2862_vm13, %v2861_v55, %v2860_v18 }
 0x725   : > { %v2765_v44 = vrot.slane %v2764_v30, 2  ;;  %v2866_v34 = vsel %vm2865_vm3, %v2864_v14, %v2863_v46 }
 0x726   : > { %v2869_v33 = vsel %vm2868_vm14, %v2867_v4, %v2866_v34 }
 0x727   : > { %v2766_v10 = vadd.f32 %v2765_v44, %v2764_v30 }
 0x729   : > { %v2767_v40 = vrot.slane %v2766_v10, 1 }
 0x72b   : > { %v2768_v22 = vadd.f32 %v2767_v40, %v2766_v10 }
 0x72d   : > { %v2807_v28 = vmul.f32 %v2791_v62, %v2768_v22 }
 0x72f   : > { %v2815_v20 = vpack.c.bf16 %v2807_v28, %v2807_v28 }
 0x731   : > { %v2851_v35 = vunpack.c.l.b16 %v2815_v20 }
 0x733   : > { %v2870_v24 = vrot.slane %v2851_v35, 1 }
 0x735   : > { %v2872_v50 = vsel %vm2871_vm15, %v2870_v24, %v2869_v33 }
 0x736   : > { %v2873_v7 = vpack.c.b16 %v2872_v50, %v2872_v50 }
 0x738   : > { %2931 = vmatmul.bf16.vlgmr.msra.gmra.mxu1 %v2873_v7 }
 0x7b5   : > { %v2932_v56 = vpop.f32.mrf.mxu1 }
 0x7b6   : > { %v2933_v42 = vadd.f32 %v3568_v19, %v2932_v56 }
 0x7b8   : > { %2936 = vst [vmem:[%s538_s20] sm:$0xff] %v2933_v42 }
 0x7bd   : > { %v2934_v57 = vpop.f32.mrf.mxu1 }
 0x7be PF: > { %s26_s21 = sadd.s32 1, %s3644_s21  }
 0x7bf   : > { %p23_p5 = scmp.ge.s32.totalorder %s26_s21, 4  }
 0x7c1   :  { %25 = sbr.rel (!%p23_p5) target bundleno = 2 (0x2), region = 117 }

</bundles_post_ra>
